<compile_context>
chip_gen: v7x
topology: tpu7x:2x2x1
jax: 0.10.0
libtpu: 0.0.40
codegen_flags: <defaults>
</compile_context>

<pallas_src>
import functools

import jax
import jax.numpy as jnp
from jax.experimental import pallas as pl
from jax.experimental.pallas import tpu as pltpu

# ----------------------------- mini-DenseNet config -----------------------------
NUM_INIT_FEATURES = 16
GROWTH_RATE = 8
BN_SIZE = 4
BLOCK_CONFIG = (2, 2)
BN_EPS = 1e-5
INPUT_HW = 32
# stem conv /2, stem maxpool /2, one 2x2 avgpool per transition
FINAL_HW = INPUT_HW // 4 // (2 ** (len(BLOCK_CONFIG) - 1))          # = 4


# ----------------------------- Pallas kernels -----------------------------
def _fused_conv_mm_kernel(*refs, has_pro, has_epi, epi_relu):
    """out = [epilogue BN(+ReLU)]( W @ [prologue BN+ReLU](x) )

    refs (in order): w (cout,K) bf16, x (K,TM) bf16,
                     [psc, psh (K,1) f32]    if has_pro,
                     [esc, esh (cout,1) f32] if has_epi,
                     o (cout,TM).
    """
    i = 0
    w_ref = refs[i]; i += 1
    x_ref = refs[i]; i += 1
    if has_pro:
        psc_ref, psh_ref = refs[i], refs[i + 1]; i += 2
    if has_epi:
        esc_ref, esh_ref = refs[i], refs[i + 1]; i += 2
    o_ref = refs[i]

    x = x_ref[...]
    if has_pro:
        # pre-activation BN + ReLU in f32, cast back to bf16 for the MXU.
        xf = x.astype(jnp.float32) * psc_ref[...] + psh_ref[...]
        x = jnp.maximum(xf, 0.0).astype(jnp.bfloat16)
    acc = jnp.dot(w_ref[...], x, preferred_element_type=jnp.float32)
    if has_epi:
        acc = acc * esc_ref[...] + esh_ref[...]
        if epi_relu:
            acc = jnp.maximum(acc, 0.0)
    o_ref[...] = acc.astype(o_ref.dtype)


def conv_matmul(w_t, x, pro=None, epi=None, epi_relu=True, out_dtype=jnp.bfloat16):
    """Fused conv-as-matmul. w_t: (cout, K) bf16, x: (K, M) bf16 -> (cout, M)."""
    cout, K = w_t.shape
    M = x.shape[1]
    # Whole-M blocks for the small maps; 256-lane tiles when M is large enough to give
    # the grid >=2 "parallel" steps (feeds both v7x TensorCores). M always divides TM
    # exactly, so no pad/slice round trips are needed.
    TM = 256 if (M > 256 and M % 256 == 0) else M
    grid = (M // TM,)

    in_specs = [
        pl.BlockSpec((cout, K), lambda i: (0, 0)),
        pl.BlockSpec((K, TM), lambda i: (0, i)),
    ]
    args = [w_t, x]
    if pro is not None:
        psc, psh = pro
        in_specs += [pl.BlockSpec((K, 1), lambda i: (0, 0)),
                     pl.BlockSpec((K, 1), lambda i: (0, 0))]
        args += [psc.reshape(K, 1), psh.reshape(K, 1)]
    if epi is not None:
        esc, esh = epi
        in_specs += [pl.BlockSpec((cout, 1), lambda i: (0, 0)),
                     pl.BlockSpec((cout, 1), lambda i: (0, 0))]
        args += [esc.reshape(cout, 1), esh.reshape(cout, 1)]

    kernel = functools.partial(_fused_conv_mm_kernel, has_pro=pro is not None,
                               has_epi=epi is not None, epi_relu=epi_relu)
    return pl.pallas_call(
        kernel,
        out_shape=jax.ShapeDtypeStruct((cout, M), out_dtype),
        grid=grid,
        in_specs=in_specs,
        out_specs=pl.BlockSpec((cout, TM), lambda i: (0, i)),
        compiler_params=pltpu.CompilerParams(dimension_semantics=("parallel",)),
    )(*args)


def _regressor_kernel(x_ref, w_ref, b_ref, o_ref):
    # Linear (with norm5 pre-folded into w/b) + F.normalize(p=2, dim=1), f32 accumulation.
    y = jnp.dot(x_ref[...], w_ref[...], preferred_element_type=jnp.float32) + b_ref[...]
    ss = jnp.sum(y * y, axis=-1, keepdims=True)
    o_ref[...] = y * jax.lax.rsqrt(jnp.maximum(ss, 1e-24))   # == y / max(||y||, 1e-12)


def pallas_regressor(x_flat, w_fc, b_fc):
    # TODO(synk): for the real 93184-wide regressor, tile K with a grid axis + f32 VMEM
    # accumulator and size tiles for v7x's 64 MiB VMEM; at this mini size whole-array
    # VMEM residency is trivial.
    B, F = x_flat.shape
    N = w_fc.shape[1]
    return pl.pallas_call(
        _regressor_kernel,
        out_shape=jax.ShapeDtypeStruct((B, N), jnp.float32),
    )(x_flat, w_fc, b_fc)


# ----------------------------- XLA glue (patches / pooling) -----------------------------
def _im2col_cf(x, kh, kw, stride, pad):
    """x: (C, N, H, W) -> (kh*kw*C, N*Ho*Wo); K order = (ki, kj, c)."""
    # TODO(synk): for full-size inputs, replace this HBM patch materialization with an
    # in-kernel tap accumulation (grid axis over (ki,kj) + VMEM accumulator).
    xp = jnp.pad(x, ((0, 0), (0, 0), (pad, pad), (pad, pad)))
    C, N, H, W = xp.shape
    Ho = (H - kh) // stride + 1
    Wo = (W - kw) // stride + 1
    taps = []
    for i in range(kh):
        for j in range(kw):
            taps.append(xp[:, :, i:i + stride * Ho:stride, j:j + stride * Wo:stride])
    cols = jnp.concatenate(taps, axis=0)            # (kh*kw*C, N, Ho, Wo)
    return cols.reshape(kh * kw * C, N * Ho * Wo), (Ho, Wo)


def maxpool_3x3_s2_p1_cf(x):
    # TODO(synk): pooling left as XLA glue (reduce_window); not the matmul hot path.
    return jax.lax.reduce_window(
        x, jnp.array(-jnp.inf, x.dtype), jax.lax.max,
        window_dimensions=(1, 1, 3, 3),
        window_strides=(1, 1, 2, 2),
        padding=((0, 0), (0, 0), (1, 1), (1, 1)),
    )


def avgpool_2x2_cf(x):
    C, N, H, W = x.shape
    xf = x.astype(jnp.float32).reshape(C, N, H // 2, 2, W // 2, 2)
    return xf.mean(axis=(3, 5)).astype(x.dtype)


# ----------------------------- parameters -----------------------------
def init_params(key):
    keys = iter(jax.random.split(key, 64))

    def conv_w(kh, kw, cin, cout):
        fan_in = kh * kw * cin
        return jax.random.normal(next(keys), (kh, kw, cin, cout), jnp.float32) / jnp.sqrt(
            jnp.float32(fan_in))

    def bn_p(c):
        gamma = 1.0 + 0.1 * jax.random.normal(next(keys), (c,), jnp.float32)
        beta = 0.1 * jax.random.normal(next(keys), (c,), jnp.float32)
        mean = 0.1 * jax.random.normal(next(keys), (c,), jnp.float32)
        var = 1.0 + 0.1 * jnp.abs(jax.random.normal(next(keys), (c,), jnp.float32))
        return (gamma, beta, mean, var)

    params = {}
    params["conv0_w"] = conv_w(7, 7, 3, NUM_INIT_FEATURES)
    params["norm0"] = bn_p(NUM_INIT_FEATURES)

    c = NUM_INIT_FEATURES
    for bi, nlayers in enumerate(BLOCK_CONFIG):
        for li in range(nlayers):
            lp = {}
            lp["norm1"] = bn_p(c)
            lp["conv1_w"] = conv_w(1, 1, c, BN_SIZE * GROWTH_RATE)
            lp["norm2"] = bn_p(BN_SIZE * GROWTH_RATE)
            lp["conv2_w"] = conv_w(3, 3, BN_SIZE * GROWTH_RATE, GROWTH_RATE)
            params[f"block{bi}_layer{li}"] = lp
            c += GROWTH_RATE
        if bi < len(BLOCK_CONFIG) - 1:
            params[f"trans{bi}"] = {"norm": bn_p(c), "conv_w": conv_w(1, 1, c, c // 2)}
            c = c // 2
    params["norm5"] = bn_p(c)

    in_feat = c * FINAL_HW * FINAL_HW          # analogue of 93184
    params["fc_w"] = jax.random.normal(next(keys), (in_feat, 3), jnp.float32) / jnp.sqrt(
        jnp.float32(in_feat))
    params["fc_b"] = 0.01 * jax.random.normal(next(keys), (3,), jnp.float32)
    return params


def prepare_params(params):
    """One-time inference prep: fold BN into (scale, shift) f32 pairs, transpose conv
    weights to (cout, kh*kw*cin) bf16 for the MXU, and fold norm5 into the fc."""
    def fold_bn(bn):
        gamma, beta, mean, var = bn
        s = gamma / jnp.sqrt(var + BN_EPS)
        return s.astype(jnp.float32), (beta - mean * s).astype(jnp.float32)

    def wt(w):   # (kh, kw, cin, cout) -> (cout, kh*kw*cin); K order (ki, kj, c)
        kh, kw, cin, cout = w.shape
        return w.reshape(kh * kw * cin, cout).T.astype(jnp.bfloat16)

    prep = {"conv0_w": wt(params["conv0_w"]), "norm0": fold_bn(params["norm0"])}
    for bi, nlayers in enumerate(BLOCK_CONFIG):
        for li in range(nlayers):
            lp = params[f"block{bi}_layer{li}"]
            prep[f"block{bi}_layer{li}"] = {
                "norm1": fold_bn(lp["norm1"]), "conv1_w": wt(lp["conv1_w"]),
                "norm2": fold_bn(lp["norm2"]), "conv2_w": wt(lp["conv2_w"]),
            }
        if bi < len(BLOCK_CONFIG) - 1:
            tp = params[f"trans{bi}"]
            prep[f"trans{bi}"] = {"norm": fold_bn(tp["norm"]), "conv_w": wt(tp["conv_w"])}

    # norm5 is a BN with no ReLU directly before the Linear, so fold it in:
    #   (x*s + t) @ W + b == x @ (s[:,None]*W) + (t @ W + b)
    # The PyTorch flatten order is (C, H, W) -> repeat per-channel scale H*W times.
    s5, t5 = fold_bn(params["norm5"])
    hw = FINAL_HW * FINAL_HW
    s_flat = jnp.repeat(s5, hw)
    t_flat = jnp.repeat(t5, hw)
    w_fc = params["fc_w"]
    prep["fc_w"] = (s_flat[:, None] * w_fc).astype(jnp.bfloat16)
    prep["fc_b"] = (params["fc_b"] + t_flat @ w_fc).reshape(1, -1).astype(jnp.float32)
    return prep


# ----------------------------- forward -----------------------------
def densenet_upright_forward(prep, x_nchw):
    batch = x_nchw.shape[0]
    # channels-first layout (C, N, H, W): the big N*H*W axis lives on the 128 lanes.
    x = jnp.transpose(x_nchw, (1, 0, 2, 3)).astype(jnp.bfloat16)

    # stem: conv7x7/s2 with norm0+ReLU fused as epilogue, then maxpool3x3/s2.
    cols, (ho, wo) = _im2col_cf(x, 7, 7, 2, 3)
    h = conv_matmul(prep["conv0_w"], cols, epi=prep["norm0"])        # (16, N*16*16)
    h = maxpool_3x3_s2_p1_cf(h.reshape(NUM_INIT_FEATURES, batch, ho, wo))
    c, hh, ww = NUM_INIT_FEATURES, ho // 2, wo // 2
    feat = h.reshape(c, batch * hh * ww)

    # dense blocks (bottleneck layers) + transitions
    for bi, nlayers in enumerate(BLOCK_CONFIG):
        for li in range(nlayers):
            lp = prep[f"block{bi}_layer{li}"]
            # 1x1 bottleneck: norm1+ReLU prologue and norm2+ReLU epilogue in ONE kernel.
            mid = conv_matmul(lp["conv1_w"], feat, pro=lp["norm1"], epi=lp["norm2"])
            # 3x3 conv (raw output; the next layer's norm1 / transition norm consumes it).
            cols, _ = _im2col_cf(mid.reshape(BN_SIZE * GROWTH_RATE, batch, hh, ww),
                                 3, 3, 1, 1)
            y = conv_matmul(lp["conv2_w"], cols)
            # TODO(synk): write y straight into a preallocated block-wide channel buffer
            # via out_specs/input_output_aliases (needs channel padding to respect the
            # (8,128) out-block rule); concat is cheap at this mini scale.
            feat = jnp.concatenate([feat, y], axis=0)
            c += GROWTH_RATE
        if bi < len(BLOCK_CONFIG) - 1:
            tp = prep[f"trans{bi}"]
            t = conv_matmul(tp["conv_w"], feat, pro=tp["norm"])      # BN+ReLU prologue
            c //= 2
            t = avgpool_2x2_cf(t.reshape(c, batch, hh, ww))
            hh //= 2
            ww //= 2
            feat = t.reshape(c, batch * hh * ww)

    # x.view(batch, -1) on a contiguous NCHW tensor -> flatten in (C, H, W) order.
    x_flat = jnp.transpose(feat.reshape(c, batch, hh * ww), (1, 0, 2)).reshape(batch, -1)

    # regressor (with norm5 folded in) + F.normalize, fused in one Pallas kernel.
    return pallas_regressor(x_flat, prep["fc_w"], prep["fc_b"])


# ----------------------------- main -----------------------------
if __name__ == "__main__":
    root = jax.random.PRNGKey(0)
    pkey, xkey = jax.random.split(root)
    params = init_params(pkey)
    prep = prepare_params(params)
    x = jax.random.normal(xkey, (2, 3, INPUT_HW, INPUT_HW), jnp.float32)  # NCHW like PyTorch

    fwd = jax.jit(densenet_upright_forward)
    out = jax.block_until_ready(fwd(prep, x))

    assert out.shape == (2, 3) and out.dtype == jnp.float32
    assert bool(jnp.all(jnp.isfinite(out)))
    norms = jnp.linalg.norm(out, axis=1)
    assert bool(jnp.all(jnp.abs(norms - 1.0) < 1e-3))   # rows L2-normalized (f32 epilogue)
    print("KERNEL_OK")
</pallas_src>

<mosaic_0001>
module attributes {stable_mosaic.version = 11 : i64} {
  func.func @_fused_conv_mm_kernel(%arg0: i32, %arg1: memref<16x147xbf16, #tpu.memory_space<vmem>>, %arg2: memref<147x256xbf16, #tpu.memory_space<vmem>>, %arg3: memref<16x1xf32, #tpu.memory_space<vmem>>, %arg4: memref<16x1xf32, #tpu.memory_space<vmem>>, %arg5: memref<16x256xbf16, #tpu.memory_space<vmem>>) attributes {dimension_semantics = [#tpu.dimension_semantics<parallel>], iteration_bounds = array<i64: 2>, scalar_prefetch = 0 : i64, scratch_operands = 0 : i64, tpu.core_type = #tpu.core_type<tc>, window_params = [{pipeline_mode = #tpu.pipeline_mode<synchronous>, transform_indices = @transform_0, window_bounds = array<i64: 16, 147>}, {transform_indices = @transform_1, window_bounds = array<i64: 147, 256>}, {pipeline_mode = #tpu.pipeline_mode<synchronous>, transform_indices = @transform_2, window_bounds = array<i64: 16, 1>}, {pipeline_mode = #tpu.pipeline_mode<synchronous>, transform_indices = @transform_3, window_bounds = array<i64: 16, 1>}, {transform_indices = @transform_4, window_bounds = array<i64: 16, 256>}]} {
    %c0 = arith.constant 0 : index
    %c0_0 = arith.constant 0 : index
    %0 = vector.load %arg2[%c0, %c0_0] : memref<147x256xbf16, #tpu.memory_space<vmem>>, vector<147x256xbf16>
    %c0_1 = arith.constant 0 : index
    %c0_2 = arith.constant 0 : index
    %1 = vector.load %arg1[%c0_1, %c0_2] : memref<16x147xbf16, #tpu.memory_space<vmem>>, vector<16x147xbf16>
    %cst = arith.constant dense<0.000000e+00> : vector<16x256xf32>
    %2 = tpu.matmul %1, %0, %cst {dimension_numbers = #tpu.dot_dimension_numbers<[1], [0], [0], [1], [0, 0, 1, 1], [], []>} : vector<16x147xbf16>, vector<147x256xbf16>, vector<16x256xf32> -> vector<16x256xf32>
    %c0_3 = arith.constant 0 : index
    %c0_4 = arith.constant 0 : index
    %3 = vector.load %arg3[%c0_3, %c0_4] : memref<16x1xf32, #tpu.memory_space<vmem>>, vector<16x1xf32>
    %4 = vector.broadcast %3 : vector<16x1xf32> to vector<16x256xf32>
    %5 = arith.mulf %2, %4 : vector<16x256xf32>
    %c0_5 = arith.constant 0 : index
    %c0_6 = arith.constant 0 : index
    %6 = vector.load %arg4[%c0_5, %c0_6] : memref<16x1xf32, #tpu.memory_space<vmem>>, vector<16x1xf32>
    %7 = vector.broadcast %6 : vector<16x1xf32> to vector<16x256xf32>
    %8 = arith.addf %5, %7 : vector<16x256xf32>
    %cst_7 = arith.constant 0.000000e+00 : f32
    %9 = vector.broadcast %cst_7 : f32 to vector<16x256xf32>
    %10 = arith.maximumf %8, %9 : vector<16x256xf32>
    %11 = arith.truncf %10 : vector<16x256xf32> to vector<16x256xbf16>
    %c0_8 = arith.constant 0 : index
    %c0_9 = arith.constant 0 : index
    %12 = vector.load %arg5[%c0_8, %c0_9] : memref<16x256xbf16, #tpu.memory_space<vmem>>, vector<16x256xbf16>
    tpu.vector_store %arg5[%c0_8, %c0_9], %11 {strides = array<i32>} : memref<16x256xbf16, #tpu.memory_space<vmem>>, vector<16x256xbf16>,
    return
  }
  func.func @transform_0(%arg0: i32) -> (i32, i32) {
    %c0_i32 = arith.constant 0 : i32
    %c0_i32_0 = arith.constant 0 : i32
    %c0_i32_1 = arith.constant 0 : i32
    return %c0_i32, %c0_i32_0 : i32, i32
  }
  func.func @transform_1(%arg0: i32) -> (i32, i32) {
    %c0_i32 = arith.constant 0 : i32
    %c0_i32_0 = arith.constant 0 : i32
    return %c0_i32, %arg0 : i32, i32
  }
  func.func @transform_2(%arg0: i32) -> (i32, i32) {
    %c0_i32 = arith.constant 0 : i32
    %c0_i32_0 = arith.constant 0 : i32
    %c0_i32_1 = arith.constant 0 : i32
    return %c0_i32, %c0_i32_0 : i32, i32
  }
  func.func @transform_3(%arg0: i32) -> (i32, i32) {
    %c0_i32 = arith.constant 0 : i32
    %c0_i32_0 = arith.constant 0 : i32
    %c0_i32_1 = arith.constant 0 : i32
    return %c0_i32, %c0_i32_0 : i32, i32
  }
  func.func @transform_4(%arg0: i32) -> (i32, i32) {
    %c0_i32 = arith.constant 0 : i32
    %c0_i32_0 = arith.constant 0 : i32
    return %c0_i32, %arg0 : i32, i32
  }
}

module attributes {stable_mosaic.version = 11 : i64} {
  func.func @_fused_conv_mm_kernel(%arg0: i32, %arg1: memref<32x16xbf16, #tpu.memory_space<vmem>>, %arg2: memref<16x128xbf16, #tpu.memory_space<vmem>>, %arg3: memref<16x1xf32, #tpu.memory_space<vmem>>, %arg4: memref<16x1xf32, #tpu.memory_space<vmem>>, %arg5: memref<32x1xf32, #tpu.memory_space<vmem>>, %arg6: memref<32x1xf32, #tpu.memory_space<vmem>>, %arg7: memref<32x128xbf16, #tpu.memory_space<vmem>>) attributes {dimension_semantics = [#tpu.dimension_semantics<parallel>], iteration_bounds = array<i64: 1>, scalar_prefetch = 0 : i64, scratch_operands = 0 : i64, tpu.core_type = #tpu.core_type<tc>, window_params = [{pipeline_mode = #tpu.pipeline_mode<synchronous>, transform_indices = @transform_0, window_bounds = array<i64: 32, 16>}, {transform_indices = @transform_1, window_bounds = array<i64: 16, 128>}, {pipeline_mode = #tpu.pipeline_mode<synchronous>, transform_indices = @transform_2, window_bounds = array<i64: 16, 1>}, {pipeline_mode = #tpu.pipeline_mode<synchronous>, transform_indices = @transform_3, window_bounds = array<i64: 16, 1>}, {pipeline_mode = #tpu.pipeline_mode<synchronous>, transform_indices = @transform_4, window_bounds = array<i64: 32, 1>}, {pipeline_mode = #tpu.pipeline_mode<synchronous>, transform_indices = @transform_5, window_bounds = array<i64: 32, 1>}, {transform_indices = @transform_6, window_bounds = array<i64: 32, 128>}]} {
    %c0 = arith.constant 0 : index
    %c0_0 = arith.constant 0 : index
    %0 = vector.load %arg2[%c0, %c0_0] : memref<16x128xbf16, #tpu.memory_space<vmem>>, vector<16x128xbf16>
    %1 = arith.extf %0 : vector<16x128xbf16> to vector<16x128xf32>
    %c0_1 = arith.constant 0 : index
    %c0_2 = arith.constant 0 : index
    %2 = vector.load %arg3[%c0_1, %c0_2] : memref<16x1xf32, #tpu.memory_space<vmem>>, vector<16x1xf32>
    %3 = vector.broadcast %2 : vector<16x1xf32> to vector<16x128xf32>
    %4 = arith.mulf %1, %3 : vector<16x128xf32>
    %c0_3 = arith.constant 0 : index
    %c0_4 = arith.constant 0 : index
    %5 = vector.load %arg4[%c0_3, %c0_4] : memref<16x1xf32, #tpu.memory_space<vmem>>, vector<16x1xf32>
    %6 = vector.broadcast %5 : vector<16x1xf32> to vector<16x128xf32>
    %7 = arith.addf %4, %6 : vector<16x128xf32>
    %cst = arith.constant 0.000000e+00 : f32
    %8 = vector.broadcast %cst : f32 to vector<16x128xf32>
    %9 = arith.maximumf %7, %8 : vector<16x128xf32>
    %10 = arith.truncf %9 : vector<16x128xf32> to vector<16x128xbf16>
    %c0_5 = arith.constant 0 : index
    %c0_6 = arith.constant 0 : index
    %11 = vector.load %arg1[%c0_5, %c0_6] : memref<32x16xbf16, #tpu.memory_space<vmem>>, vector<32x16xbf16>
    %cst_7 = arith.constant dense<0.000000e+00> : vector<32x128xf32>
    %12 = tpu.matmul %11, %10, %cst_7 {dimension_numbers = #tpu.dot_dimension_numbers<[1], [0], [0], [1], [0, 0, 1, 1], [], []>} : vector<32x16xbf16>, vector<16x128xbf16>, vector<32x128xf32> -> vector<32x128xf32>
    %c0_8 = arith.constant 0 : index
    %c0_9 = arith.constant 0 : index
    %13 = vector.load %arg5[%c0_8, %c0_9] : memref<32x1xf32, #tpu.memory_space<vmem>>, vector<32x1xf32>
    %14 = vector.broadcast %13 : vector<32x1xf32> to vector<32x128xf32>
    %15 = arith.mulf %12, %14 : vector<32x128xf32>
    %c0_10 = arith.constant 0 : index
    %c0_11 = arith.constant 0 : index
    %16 = vector.load %arg6[%c0_10, %c0_11] : memref<32x1xf32, #tpu.memory_space<vmem>>, vector<32x1xf32>
    %17 = vector.broadcast %16 : vector<32x1xf32> to vector<32x128xf32>
    %18 = arith.addf %15, %17 : vector<32x128xf32>
    %cst_12 = arith.constant 0.000000e+00 : f32
    %19 = vector.broadcast %cst_12 : f32 to vector<32x128xf32>
    %20 = arith.maximumf %18, %19 : vector<32x128xf32>
    %21 = arith.truncf %20 : vector<32x128xf32> to vector<32x128xbf16>
    %c0_13 = arith.constant 0 : index
    %c0_14 = arith.constant 0 : index
    %22 = vector.load %arg7[%c0_13, %c0_14] : memref<32x128xbf16, #tpu.memory_space<vmem>>, vector<32x128xbf16>
    tpu.vector_store %arg7[%c0_13, %c0_14], %21 {strides = array<i32>} : memref<32x128xbf16, #tpu.memory_space<vmem>>, vector<32x128xbf16>,
    return
  }
  func.func @transform_0(%arg0: i32) -> (i32, i32) {
    %c0_i32 = arith.constant 0 : i32
    %c0_i32_0 = arith.constant 0 : i32
    %c0_i32_1 = arith.constant 0 : i32
    return %c0_i32, %c0_i32_0 : i32, i32
  }
  func.func @transform_1(%arg0: i32) -> (i32, i32) {
    %c0_i32 = arith.constant 0 : i32
    %c0_i32_0 = arith.constant 0 : i32
    return %c0_i32, %arg0 : i32, i32
  }
  func.func @transform_2(%arg0: i32) -> (i32, i32) {
    %c0_i32 = arith.constant 0 : i32
    %c0_i32_0 = arith.constant 0 : i32
    %c0_i32_1 = arith.constant 0 : i32
    return %c0_i32, %c0_i32_0 : i32, i32
  }
  func.func @transform_3(%arg0: i32) -> (i32, i32) {
    %c0_i32 = arith.constant 0 : i32
    %c0_i32_0 = arith.constant 0 : i32
    %c0_i32_1 = arith.constant 0 : i32
    return %c0_i32, %c0_i32_0 : i32, i32
  }
  func.func @transform_4(%arg0: i32) -> (i32, i32) {
    %c0_i32 = arith.constant 0 : i32
    %c0_i32_0 = arith.constant 0 : i32
    %c0_i32_1 = arith.constant 0 : i32
    return %c0_i32, %c0_i32_0 : i32, i32
  }
  func.func @transform_5(%arg0: i32) -> (i32, i32) {
    %c0_i32 = arith.constant 0 : i32
    %c0_i32_0 = arith.constant 0 : i32
    %c0_i32_1 = arith.constant 0 : i32
    return %c0_i32, %c0_i32_0 : i32, i32
  }
  func.func @transform_6(%arg0: i32) -> (i32, i32) {
    %c0_i32 = arith.constant 0 : i32
    %c0_i32_0 = arith.constant 0 : i32
    return %c0_i32, %arg0 : i32, i32
  }
}

module attributes {stable_mosaic.version = 11 : i64} {
  func.func @_fused_conv_mm_kernel(%arg0: i32, %arg1: memref<32x24xbf16, #tpu.memory_space<vmem>>, %arg2: memref<24x128xbf16, #tpu.memory_space<vmem>>, %arg3: memref<24x1xf32, #tpu.memory_space<vmem>>, %arg4: memref<24x1xf32, #tpu.memory_space<vmem>>, %arg5: memref<32x1xf32, #tpu.memory_space<vmem>>, %arg6: memref<32x1xf32, #tpu.memory_space<vmem>>, %arg7: memref<32x128xbf16, #tpu.memory_space<vmem>>) attributes {dimension_semantics = [#tpu.dimension_semantics<parallel>], iteration_bounds = array<i64: 1>, scalar_prefetch = 0 : i64, scratch_operands = 0 : i64, tpu.core_type = #tpu.core_type<tc>, window_params = [{pipeline_mode = #tpu.pipeline_mode<synchronous>, transform_indices = @transform_0, window_bounds = array<i64: 32, 24>}, {transform_indices = @transform_1, window_bounds = array<i64: 24, 128>}, {pipeline_mode = #tpu.pipeline_mode<synchronous>, transform_indices = @transform_2, window_bounds = array<i64: 24, 1>}, {pipeline_mode = #tpu.pipeline_mode<synchronous>, transform_indices = @transform_3, window_bounds = array<i64: 24, 1>}, {pipeline_mode = #tpu.pipeline_mode<synchronous>, transform_indices = @transform_4, window_bounds = array<i64: 32, 1>}, {pipeline_mode = #tpu.pipeline_mode<synchronous>, transform_indices = @transform_5, window_bounds = array<i64: 32, 1>}, {transform_indices = @transform_6, window_bounds = array<i64: 32, 128>}]} {
    %c0 = arith.constant 0 : index
    %c0_0 = arith.constant 0 : index
    %0 = vector.load %arg2[%c0, %c0_0] : memref<24x128xbf16, #tpu.memory_space<vmem>>, vector<24x128xbf16>
    %1 = arith.extf %0 : vector<24x128xbf16> to vector<24x128xf32>
    %c0_1 = arith.constant 0 : index
    %c0_2 = arith.constant 0 : index
    %2 = vector.load %arg3[%c0_1, %c0_2] : memref<24x1xf32, #tpu.memory_space<vmem>>, vector<24x1xf32>
    %3 = vector.broadcast %2 : vector<24x1xf32> to vector<24x128xf32>
    %4 = arith.mulf %1, %3 : vector<24x128xf32>
    %c0_3 = arith.constant 0 : index
    %c0_4 = arith.constant 0 : index
    %5 = vector.load %arg4[%c0_3, %c0_4] : memref<24x1xf32, #tpu.memory_space<vmem>>, vector<24x1xf32>
    %6 = vector.broadcast %5 : vector<24x1xf32> to vector<24x128xf32>
    %7 = arith.addf %4, %6 : vector<24x128xf32>
    %cst = arith.constant 0.000000e+00 : f32
    %8 = vector.broadcast %cst : f32 to vector<24x128xf32>
    %9 = arith.maximumf %7, %8 : vector<24x128xf32>
    %10 = arith.truncf %9 : vector<24x128xf32> to vector<24x128xbf16>
    %c0_5 = arith.constant 0 : index
    %c0_6 = arith.constant 0 : index
    %11 = vector.load %arg1[%c0_5, %c0_6] : memref<32x24xbf16, #tpu.memory_space<vmem>>, vector<32x24xbf16>
    %cst_7 = arith.constant dense<0.000000e+00> : vector<32x128xf32>
    %12 = tpu.matmul %11, %10, %cst_7 {dimension_numbers = #tpu.dot_dimension_numbers<[1], [0], [0], [1], [0, 0, 1, 1], [], []>} : vector<32x24xbf16>, vector<24x128xbf16>, vector<32x128xf32> -> vector<32x128xf32>
    %c0_8 = arith.constant 0 : index
    %c0_9 = arith.constant 0 : index
    %13 = vector.load %arg5[%c0_8, %c0_9] : memref<32x1xf32, #tpu.memory_space<vmem>>, vector<32x1xf32>
    %14 = vector.broadcast %13 : vector<32x1xf32> to vector<32x128xf32>
    %15 = arith.mulf %12, %14 : vector<32x128xf32>
    %c0_10 = arith.constant 0 : index
    %c0_11 = arith.constant 0 : index
    %16 = vector.load %arg6[%c0_10, %c0_11] : memref<32x1xf32, #tpu.memory_space<vmem>>, vector<32x1xf32>
    %17 = vector.broadcast %16 : vector<32x1xf32> to vector<32x128xf32>
    %18 = arith.addf %15, %17 : vector<32x128xf32>
    %cst_12 = arith.constant 0.000000e+00 : f32
    %19 = vector.broadcast %cst_12 : f32 to vector<32x128xf32>
    %20 = arith.maximumf %18, %19 : vector<32x128xf32>
    %21 = arith.truncf %20 : vector<32x128xf32> to vector<32x128xbf16>
    %c0_13 = arith.constant 0 : index
    %c0_14 = arith.constant 0 : index
    %22 = vector.load %arg7[%c0_13, %c0_14] : memref<32x128xbf16, #tpu.memory_space<vmem>>, vector<32x128xbf16>
    tpu.vector_store %arg7[%c0_13, %c0_14], %21 {strides = array<i32>} : memref<32x128xbf16, #tpu.memory_space<vmem>>, vector<32x128xbf16>,
    return
  }
  func.func @transform_0(%arg0: i32) -> (i32, i32) {
    %c0_i32 = arith.constant 0 : i32
    %c0_i32_0 = arith.constant 0 : i32
    %c0_i32_1 = arith.constant 0 : i32
    return %c0_i32, %c0_i32_0 : i32, i32
  }
  func.func @transform_1(%arg0: i32) -> (i32, i32) {
    %c0_i32 = arith.constant 0 : i32
    %c0_i32_0 = arith.constant 0 : i32
    return %c0_i32, %arg0 : i32, i32
  }
  func.func @transform_2(%arg0: i32) -> (i32, i32) {
    %c0_i32 = arith.constant 0 : i32
    %c0_i32_0 = arith.constant 0 : i32
    %c0_i32_1 = arith.constant 0 : i32
    return %c0_i32, %c0_i32_0 : i32, i32
  }
  func.func @transform_3(%arg0: i32) -> (i32, i32) {
    %c0_i32 = arith.constant 0 : i32
    %c0_i32_0 = arith.constant 0 : i32
    %c0_i32_1 = arith.constant 0 : i32
    return %c0_i32, %c0_i32_0 : i32, i32
  }
  func.func @transform_4(%arg0: i32) -> (i32, i32) {
    %c0_i32 = arith.constant 0 : i32
    %c0_i32_0 = arith.constant 0 : i32
    %c0_i32_1 = arith.constant 0 : i32
    return %c0_i32, %c0_i32_0 : i32, i32
  }
  func.func @transform_5(%arg0: i32) -> (i32, i32) {
    %c0_i32 = arith.constant 0 : i32
    %c0_i32_0 = arith.constant 0 : i32
    %c0_i32_1 = arith.constant 0 : i32
    return %c0_i32, %c0_i32_0 : i32, i32
  }
  func.func @transform_6(%arg0: i32) -> (i32, i32) {
    %c0_i32 = arith.constant 0 : i32
    %c0_i32_0 = arith.constant 0 : i32
    return %c0_i32, %arg0 : i32, i32
  }
}

module attributes {stable_mosaic.version = 11 : i64} {
  func.func @_fused_conv_mm_kernel(%arg0: i32, %arg1: memref<8x288xbf16, #tpu.memory_space<vmem>>, %arg2: memref<288x128xbf16, #tpu.memory_space<vmem>>, %arg3: memref<8x128xbf16, #tpu.memory_space<vmem>>) attributes {dimension_semantics = [#tpu.dimension_semantics<parallel>], iteration_bounds = array<i64: 1>, scalar_prefetch = 0 : i64, scratch_operands = 0 : i64, tpu.core_type = #tpu.core_type<tc>, window_params = [{pipeline_mode = #tpu.pipeline_mode<synchronous>, transform_indices = @transform_0, window_bounds = array<i64: 8, 288>}, {transform_indices = @transform_1, window_bounds = array<i64: 288, 128>}, {transform_indices = @transform_2, window_bounds = array<i64: 8, 128>}]} {
    %c0 = arith.constant 0 : index
    %c0_0 = arith.constant 0 : index
    %0 = vector.load %arg2[%c0, %c0_0] : memref<288x128xbf16, #tpu.memory_space<vmem>>, vector<288x128xbf16>
    %c0_1 = arith.constant 0 : index
    %c0_2 = arith.constant 0 : index
    %1 = vector.load %arg1[%c0_1, %c0_2] : memref<8x288xbf16, #tpu.memory_space<vmem>>, vector<8x288xbf16>
    %cst = arith.constant dense<0.000000e+00> : vector<8x128xf32>
    %2 = tpu.matmul %1, %0, %cst {dimension_numbers = #tpu.dot_dimension_numbers<[1], [0], [0], [1], [0, 0, 1, 1], [], []>} : vector<8x288xbf16>, vector<288x128xbf16>, vector<8x128xf32> -> vector<8x128xf32>
    %3 = arith.truncf %2 : vector<8x128xf32> to vector<8x128xbf16>
    %c0_3 = arith.constant 0 : index
    %c0_4 = arith.constant 0 : index
    %4 = vector.load %arg3[%c0_3, %c0_4] : memref<8x128xbf16, #tpu.memory_space<vmem>>, vector<8x128xbf16>
    tpu.vector_store %arg3[%c0_3, %c0_4], %3 {strides = array<i32>} : memref<8x128xbf16, #tpu.memory_space<vmem>>, vector<8x128xbf16>,
    return
  }
  func.func @transform_0(%arg0: i32) -> (i32, i32) {
    %c0_i32 = arith.constant 0 : i32
    %c0_i32_0 = arith.constant 0 : i32
    %c0_i32_1 = arith.constant 0 : i32
    return %c0_i32, %c0_i32_0 : i32, i32
  }
  func.func @transform_1(%arg0: i32) -> (i32, i32) {
    %c0_i32 = arith.constant 0 : i32
    %c0_i32_0 = arith.constant 0 : i32
    return %c0_i32, %arg0 : i32, i32
  }
  func.func @transform_2(%arg0: i32) -> (i32, i32) {
    %c0_i32 = arith.constant 0 : i32
    %c0_i32_0 = arith.constant 0 : i32
    return %c0_i32, %arg0 : i32, i32
  }
}

module attributes {stable_mosaic.version = 11 : i64} {
  func.func @_fused_conv_mm_kernel(%arg0: i32, %arg1: memref<16x32xbf16, #tpu.memory_space<vmem>>, %arg2: memref<32x128xbf16, #tpu.memory_space<vmem>>, %arg3: memref<32x1xf32, #tpu.memory_space<vmem>>, %arg4: memref<32x1xf32, #tpu.memory_space<vmem>>, %arg5: memref<16x128xbf16, #tpu.memory_space<vmem>>) attributes {dimension_semantics = [#tpu.dimension_semantics<parallel>], iteration_bounds = array<i64: 1>, scalar_prefetch = 0 : i64, scratch_operands = 0 : i64, tpu.core_type = #tpu.core_type<tc>, window_params = [{pipeline_mode = #tpu.pipeline_mode<synchronous>, transform_indices = @transform_0, window_bounds = array<i64: 16, 32>}, {transform_indices = @transform_1, window_bounds = array<i64: 32, 128>}, {pipeline_mode = #tpu.pipeline_mode<synchronous>, transform_indices = @transform_2, window_bounds = array<i64: 32, 1>}, {pipeline_mode = #tpu.pipeline_mode<synchronous>, transform_indices = @transform_3, window_bounds = array<i64: 32, 1>}, {transform_indices = @transform_4, window_bounds = array<i64: 16, 128>}]} {
    %c0 = arith.constant 0 : index
    %c0_0 = arith.constant 0 : index
    %0 = vector.load %arg2[%c0, %c0_0] : memref<32x128xbf16, #tpu.memory_space<vmem>>, vector<32x128xbf16>
    %1 = arith.extf %0 : vector<32x128xbf16> to vector<32x128xf32>
    %c0_1 = arith.constant 0 : index
    %c0_2 = arith.constant 0 : index
    %2 = vector.load %arg3[%c0_1, %c0_2] : memref<32x1xf32, #tpu.memory_space<vmem>>, vector<32x1xf32>
    %3 = vector.broadcast %2 : vector<32x1xf32> to vector<32x128xf32>
    %4 = arith.mulf %1, %3 : vector<32x128xf32>
    %c0_3 = arith.constant 0 : index
    %c0_4 = arith.constant 0 : index
    %5 = vector.load %arg4[%c0_3, %c0_4] : memref<32x1xf32, #tpu.memory_space<vmem>>, vector<32x1xf32>
    %6 = vector.broadcast %5 : vector<32x1xf32> to vector<32x128xf32>
    %7 = arith.addf %4, %6 : vector<32x128xf32>
    %cst = arith.constant 0.000000e+00 : f32
    %8 = vector.broadcast %cst : f32 to vector<32x128xf32>
    %9 = arith.maximumf %7, %8 : vector<32x128xf32>
    %10 = arith.truncf %9 : vector<32x128xf32> to vector<32x128xbf16>
    %c0_5 = arith.constant 0 : index
    %c0_6 = arith.constant 0 : index
    %11 = vector.load %arg1[%c0_5, %c0_6] : memref<16x32xbf16, #tpu.memory_space<vmem>>, vector<16x32xbf16>
    %cst_7 = arith.constant dense<0.000000e+00> : vector<16x128xf32>
    %12 = tpu.matmul %11, %10, %cst_7 {dimension_numbers = #tpu.dot_dimension_numbers<[1], [0], [0], [1], [0, 0, 1, 1], [], []>} : vector<16x32xbf16>, vector<32x128xbf16>, vector<16x128xf32> -> vector<16x128xf32>
    %13 = arith.truncf %12 : vector<16x128xf32> to vector<16x128xbf16>
    %c0_8 = arith.constant 0 : index
    %c0_9 = arith.constant 0 : index
    %14 = vector.load %arg5[%c0_8, %c0_9] : memref<16x128xbf16, #tpu.memory_space<vmem>>, vector<16x128xbf16>
    tpu.vector_store %arg5[%c0_8, %c0_9], %13 {strides = array<i32>} : memref<16x128xbf16, #tpu.memory_space<vmem>>, vector<16x128xbf16>,
    return
  }
  func.func @transform_0(%arg0: i32) -> (i32, i32) {
    %c0_i32 = arith.constant 0 : i32
    %c0_i32_0 = arith.constant 0 : i32
    %c0_i32_1 = arith.constant 0 : i32
    return %c0_i32, %c0_i32_0 : i32, i32
  }
  func.func @transform_1(%arg0: i32) -> (i32, i32) {
    %c0_i32 = arith.constant 0 : i32
    %c0_i32_0 = arith.constant 0 : i32
    return %c0_i32, %arg0 : i32, i32
  }
  func.func @transform_2(%arg0: i32) -> (i32, i32) {
    %c0_i32 = arith.constant 0 : i32
    %c0_i32_0 = arith.constant 0 : i32
    %c0_i32_1 = arith.constant 0 : i32
    return %c0_i32, %c0_i32_0 : i32, i32
  }
  func.func @transform_3(%arg0: i32) -> (i32, i32) {
    %c0_i32 = arith.constant 0 : i32
    %c0_i32_0 = arith.constant 0 : i32
    %c0_i32_1 = arith.constant 0 : i32
    return %c0_i32, %c0_i32_0 : i32, i32
  }
  func.func @transform_4(%arg0: i32) -> (i32, i32) {
    %c0_i32 = arith.constant 0 : i32
    %c0_i32_0 = arith.constant 0 : i32
    return %c0_i32, %arg0 : i32, i32
  }
}

module attributes {stable_mosaic.version = 11 : i64} {
  func.func @_fused_conv_mm_kernel(%arg0: i32, %arg1: memref<32x16xbf16, #tpu.memory_space<vmem>>, %arg2: memref<16x32xbf16, #tpu.memory_space<vmem>>, %arg3: memref<16x1xf32, #tpu.memory_space<vmem>>, %arg4: memref<16x1xf32, #tpu.memory_space<vmem>>, %arg5: memref<32x1xf32, #tpu.memory_space<vmem>>, %arg6: memref<32x1xf32, #tpu.memory_space<vmem>>, %arg7: memref<32x32xbf16, #tpu.memory_space<vmem>>) attributes {dimension_semantics = [#tpu.dimension_semantics<parallel>], iteration_bounds = array<i64: 1>, scalar_prefetch = 0 : i64, scratch_operands = 0 : i64, tpu.core_type = #tpu.core_type<tc>, window_params = [{pipeline_mode = #tpu.pipeline_mode<synchronous>, transform_indices = @transform_0, window_bounds = array<i64: 32, 16>}, {transform_indices = @transform_1, window_bounds = array<i64: 16, 32>}, {pipeline_mode = #tpu.pipeline_mode<synchronous>, transform_indices = @transform_2, window_bounds = array<i64: 16, 1>}, {pipeline_mode = #tpu.pipeline_mode<synchronous>, transform_indices = @transform_3, window_bounds = array<i64: 16, 1>}, {pipeline_mode = #tpu.pipeline_mode<synchronous>, transform_indices = @transform_4, window_bounds = array<i64: 32, 1>}, {pipeline_mode = #tpu.pipeline_mode<synchronous>, transform_indices = @transform_5, window_bounds = array<i64: 32, 1>}, {transform_indices = @transform_6, window_bounds = array<i64: 32, 32>}]} {
    %c0 = arith.constant 0 : index
    %c0_0 = arith.constant 0 : index
    %0 = vector.load %arg2[%c0, %c0_0] : memref<16x32xbf16, #tpu.memory_space<vmem>>, vector<16x32xbf16>
    %1 = arith.extf %0 : vector<16x32xbf16> to vector<16x32xf32>
    %c0_1 = arith.constant 0 : index
    %c0_2 = arith.constant 0 : index
    %2 = vector.load %arg3[%c0_1, %c0_2] : memref<16x1xf32, #tpu.memory_space<vmem>>, vector<16x1xf32>
    %3 = vector.broadcast %2 : vector<16x1xf32> to vector<16x32xf32>
    %4 = arith.mulf %1, %3 : vector<16x32xf32>
    %c0_3 = arith.constant 0 : index
    %c0_4 = arith.constant 0 : index
    %5 = vector.load %arg4[%c0_3, %c0_4] : memref<16x1xf32, #tpu.memory_space<vmem>>, vector<16x1xf32>
    %6 = vector.broadcast %5 : vector<16x1xf32> to vector<16x32xf32>
    %7 = arith.addf %4, %6 : vector<16x32xf32>
    %cst = arith.constant 0.000000e+00 : f32
    %8 = vector.broadcast %cst : f32 to vector<16x32xf32>
    %9 = arith.maximumf %7, %8 : vector<16x32xf32>
    %10 = arith.truncf %9 : vector<16x32xf32> to vector<16x32xbf16>
    %c0_5 = arith.constant 0 : index
    %c0_6 = arith.constant 0 : index
    %11 = vector.load %arg1[%c0_5, %c0_6] : memref<32x16xbf16, #tpu.memory_space<vmem>>, vector<32x16xbf16>
    %cst_7 = arith.constant dense<0.000000e+00> : vector<32x32xf32>
    %12 = tpu.matmul %11, %10, %cst_7 {dimension_numbers = #tpu.dot_dimension_numbers<[1], [0], [0], [1], [0, 0, 1, 1], [], []>} : vector<32x16xbf16>, vector<16x32xbf16>, vector<32x32xf32> -> vector<32x32xf32>
    %c0_8 = arith.constant 0 : index
    %c0_9 = arith.constant 0 : index
    %13 = vector.load %arg5[%c0_8, %c0_9] : memref<32x1xf32, #tpu.memory_space<vmem>>, vector<32x1xf32>
    %14 = vector.broadcast %13 : vector<32x1xf32> to vector<32x32xf32>
    %15 = arith.mulf %12, %14 : vector<32x32xf32>
    %c0_10 = arith.constant 0 : index
    %c0_11 = arith.constant 0 : index
    %16 = vector.load %arg6[%c0_10, %c0_11] : memref<32x1xf32, #tpu.memory_space<vmem>>, vector<32x1xf32>
    %17 = vector.broadcast %16 : vector<32x1xf32> to vector<32x32xf32>
    %18 = arith.addf %15, %17 : vector<32x32xf32>
    %cst_12 = arith.constant 0.000000e+00 : f32
    %19 = vector.broadcast %cst_12 : f32 to vector<32x32xf32>
    %20 = arith.maximumf %18, %19 : vector<32x32xf32>
    %21 = arith.truncf %20 : vector<32x32xf32> to vector<32x32xbf16>
    %c0_13 = arith.constant 0 : index
    %c0_14 = arith.constant 0 : index
    %22 = vector.load %arg7[%c0_13, %c0_14] : memref<32x32xbf16, #tpu.memory_space<vmem>>, vector<32x32xbf16>
    tpu.vector_store %arg7[%c0_13, %c0_14], %21 {strides = array<i32>} : memref<32x32xbf16, #tpu.memory_space<vmem>>, vector<32x32xbf16>,
    return
  }
  func.func @transform_0(%arg0: i32) -> (i32, i32) {
    %c0_i32 = arith.constant 0 : i32
    %c0_i32_0 = arith.constant 0 : i32
    %c0_i32_1 = arith.constant 0 : i32
    return %c0_i32, %c0_i32_0 : i32, i32
  }
  func.func @transform_1(%arg0: i32) -> (i32, i32) {
    %c0_i32 = arith.constant 0 : i32
    %c0_i32_0 = arith.constant 0 : i32
    return %c0_i32, %arg0 : i32, i32
  }
  func.func @transform_2(%arg0: i32) -> (i32, i32) {
    %c0_i32 = arith.constant 0 : i32
    %c0_i32_0 = arith.constant 0 : i32
    %c0_i32_1 = arith.constant 0 : i32
    return %c0_i32, %c0_i32_0 : i32, i32
  }
  func.func @transform_3(%arg0: i32) -> (i32, i32) {
    %c0_i32 = arith.constant 0 : i32
    %c0_i32_0 = arith.constant 0 : i32
    %c0_i32_1 = arith.constant 0 : i32
    return %c0_i32, %c0_i32_0 : i32, i32
  }
  func.func @transform_4(%arg0: i32) -> (i32, i32) {
    %c0_i32 = arith.constant 0 : i32
    %c0_i32_0 = arith.constant 0 : i32
    %c0_i32_1 = arith.constant 0 : i32
    return %c0_i32, %c0_i32_0 : i32, i32
  }
  func.func @transform_5(%arg0: i32) -> (i32, i32) {
    %c0_i32 = arith.constant 0 : i32
    %c0_i32_0 = arith.constant 0 : i32
    %c0_i32_1 = arith.constant 0 : i32
    return %c0_i32, %c0_i32_0 : i32, i32
  }
  func.func @transform_6(%arg0: i32) -> (i32, i32) {
    %c0_i32 = arith.constant 0 : i32
    %c0_i32_0 = arith.constant 0 : i32
    return %c0_i32, %arg0 : i32, i32
  }
}

module attributes {stable_mosaic.version = 11 : i64} {
  func.func @_fused_conv_mm_kernel(%arg0: i32, %arg1: memref<8x288xbf16, #tpu.memory_space<vmem>>, %arg2: memref<288x32xbf16, #tpu.memory_space<vmem>>, %arg3: memref<8x32xbf16, #tpu.memory_space<vmem>>) attributes {dimension_semantics = [#tpu.dimension_semantics<parallel>], iteration_bounds = array<i64: 1>, scalar_prefetch = 0 : i64, scratch_operands = 0 : i64, tpu.core_type = #tpu.core_type<tc>, window_params = [{pipeline_mode = #tpu.pipeline_mode<synchronous>, transform_indices = @transform_0, window_bounds = array<i64: 8, 288>}, {transform_indices = @transform_1, window_bounds = array<i64: 288, 32>}, {transform_indices = @transform_2, window_bounds = array<i64: 8, 32>}]} {
    %c0 = arith.constant 0 : index
    %c0_0 = arith.constant 0 : index
    %0 = vector.load %arg2[%c0, %c0_0] : memref<288x32xbf16, #tpu.memory_space<vmem>>, vector<288x32xbf16>
    %c0_1 = arith.constant 0 : index
    %c0_2 = arith.constant 0 : index
    %1 = vector.load %arg1[%c0_1, %c0_2] : memref<8x288xbf16, #tpu.memory_space<vmem>>, vector<8x288xbf16>
    %cst = arith.constant dense<0.000000e+00> : vector<8x32xf32>
    %2 = tpu.matmul %1, %0, %cst {dimension_numbers = #tpu.dot_dimension_numbers<[1], [0], [0], [1], [0, 0, 1, 1], [], []>} : vector<8x288xbf16>, vector<288x32xbf16>, vector<8x32xf32> -> vector<8x32xf32>
    %3 = arith.truncf %2 : vector<8x32xf32> to vector<8x32xbf16>
    %c0_3 = arith.constant 0 : index
    %c0_4 = arith.constant 0 : index
    %4 = vector.load %arg3[%c0_3, %c0_4] : memref<8x32xbf16, #tpu.memory_space<vmem>>, vector<8x32xbf16>
    tpu.vector_store %arg3[%c0_3, %c0_4], %3 {strides = array<i32>} : memref<8x32xbf16, #tpu.memory_space<vmem>>, vector<8x32xbf16>,
    return
  }
  func.func @transform_0(%arg0: i32) -> (i32, i32) {
    %c0_i32 = arith.constant 0 : i32
    %c0_i32_0 = arith.constant 0 : i32
    %c0_i32_1 = arith.constant 0 : i32
    return %c0_i32, %c0_i32_0 : i32, i32
  }
  func.func @transform_1(%arg0: i32) -> (i32, i32) {
    %c0_i32 = arith.constant 0 : i32
    %c0_i32_0 = arith.constant 0 : i32
    return %c0_i32, %arg0 : i32, i32
  }
  func.func @transform_2(%arg0: i32) -> (i32, i32) {
    %c0_i32 = arith.constant 0 : i32
    %c0_i32_0 = arith.constant 0 : i32
    return %c0_i32, %arg0 : i32, i32
  }
}

module attributes {stable_mosaic.version = 11 : i64} {
  func.func @_fused_conv_mm_kernel(%arg0: i32, %arg1: memref<32x24xbf16, #tpu.memory_space<vmem>>, %arg2: memref<24x32xbf16, #tpu.memory_space<vmem>>, %arg3: memref<24x1xf32, #tpu.memory_space<vmem>>, %arg4: memref<24x1xf32, #tpu.memory_space<vmem>>, %arg5: memref<32x1xf32, #tpu.memory_space<vmem>>, %arg6: memref<32x1xf32, #tpu.memory_space<vmem>>, %arg7: memref<32x32xbf16, #tpu.memory_space<vmem>>) attributes {dimension_semantics = [#tpu.dimension_semantics<parallel>], iteration_bounds = array<i64: 1>, scalar_prefetch = 0 : i64, scratch_operands = 0 : i64, tpu.core_type = #tpu.core_type<tc>, window_params = [{pipeline_mode = #tpu.pipeline_mode<synchronous>, transform_indices = @transform_0, window_bounds = array<i64: 32, 24>}, {transform_indices = @transform_1, window_bounds = array<i64: 24, 32>}, {pipeline_mode = #tpu.pipeline_mode<synchronous>, transform_indices = @transform_2, window_bounds = array<i64: 24, 1>}, {pipeline_mode = #tpu.pipeline_mode<synchronous>, transform_indices = @transform_3, window_bounds = array<i64: 24, 1>}, {pipeline_mode = #tpu.pipeline_mode<synchronous>, transform_indices = @transform_4, window_bounds = array<i64: 32, 1>}, {pipeline_mode = #tpu.pipeline_mode<synchronous>, transform_indices = @transform_5, window_bounds = array<i64: 32, 1>}, {transform_indices = @transform_6, window_bounds = array<i64: 32, 32>}]} {
    %c0 = arith.constant 0 : index
    %c0_0 = arith.constant 0 : index
    %0 = vector.load %arg2[%c0, %c0_0] : memref<24x32xbf16, #tpu.memory_space<vmem>>, vector<24x32xbf16>
    %1 = arith.extf %0 : vector<24x32xbf16> to vector<24x32xf32>
    %c0_1 = arith.constant 0 : index
    %c0_2 = arith.constant 0 : index
    %2 = vector.load %arg3[%c0_1, %c0_2] : memref<24x1xf32, #tpu.memory_space<vmem>>, vector<24x1xf32>
    %3 = vector.broadcast %2 : vector<24x1xf32> to vector<24x32xf32>
    %4 = arith.mulf %1, %3 : vector<24x32xf32>
    %c0_3 = arith.constant 0 : index
    %c0_4 = arith.constant 0 : index
    %5 = vector.load %arg4[%c0_3, %c0_4] : memref<24x1xf32, #tpu.memory_space<vmem>>, vector<24x1xf32>
    %6 = vector.broadcast %5 : vector<24x1xf32> to vector<24x32xf32>
    %7 = arith.addf %4, %6 : vector<24x32xf32>
    %cst = arith.constant 0.000000e+00 : f32
    %8 = vector.broadcast %cst : f32 to vector<24x32xf32>
    %9 = arith.maximumf %7, %8 : vector<24x32xf32>
    %10 = arith.truncf %9 : vector<24x32xf32> to vector<24x32xbf16>
    %c0_5 = arith.constant 0 : index
    %c0_6 = arith.constant 0 : index
    %11 = vector.load %arg1[%c0_5, %c0_6] : memref<32x24xbf16, #tpu.memory_space<vmem>>, vector<32x24xbf16>
    %cst_7 = arith.constant dense<0.000000e+00> : vector<32x32xf32>
    %12 = tpu.matmul %11, %10, %cst_7 {dimension_numbers = #tpu.dot_dimension_numbers<[1], [0], [0], [1], [0, 0, 1, 1], [], []>} : vector<32x24xbf16>, vector<24x32xbf16>, vector<32x32xf32> -> vector<32x32xf32>
    %c0_8 = arith.constant 0 : index
    %c0_9 = arith.constant 0 : index
    %13 = vector.load %arg5[%c0_8, %c0_9] : memref<32x1xf32, #tpu.memory_space<vmem>>, vector<32x1xf32>
    %14 = vector.broadcast %13 : vector<32x1xf32> to vector<32x32xf32>
    %15 = arith.mulf %12, %14 : vector<32x32xf32>
    %c0_10 = arith.constant 0 : index
    %c0_11 = arith.constant 0 : index
    %16 = vector.load %arg6[%c0_10, %c0_11] : memref<32x1xf32, #tpu.memory_space<vmem>>, vector<32x1xf32>
    %17 = vector.broadcast %16 : vector<32x1xf32> to vector<32x32xf32>
    %18 = arith.addf %15, %17 : vector<32x32xf32>
    %cst_12 = arith.constant 0.000000e+00 : f32
    %19 = vector.broadcast %cst_12 : f32 to vector<32x32xf32>
    %20 = arith.maximumf %18, %19 : vector<32x32xf32>
    %21 = arith.truncf %20 : vector<32x32xf32> to vector<32x32xbf16>
    %c0_13 = arith.constant 0 : index
    %c0_14 = arith.constant 0 : index
    %22 = vector.load %arg7[%c0_13, %c0_14] : memref<32x32xbf16, #tpu.memory_space<vmem>>, vector<32x32xbf16>
    tpu.vector_store %arg7[%c0_13, %c0_14], %21 {strides = array<i32>} : memref<32x32xbf16, #tpu.memory_space<vmem>>, vector<32x32xbf16>,
    return
  }
  func.func @transform_0(%arg0: i32) -> (i32, i32) {
    %c0_i32 = arith.constant 0 : i32
    %c0_i32_0 = arith.constant 0 : i32
    %c0_i32_1 = arith.constant 0 : i32
    return %c0_i32, %c0_i32_0 : i32, i32
  }
  func.func @transform_1(%arg0: i32) -> (i32, i32) {
    %c0_i32 = arith.constant 0 : i32
    %c0_i32_0 = arith.constant 0 : i32
    return %c0_i32, %arg0 : i32, i32
  }
  func.func @transform_2(%arg0: i32) -> (i32, i32) {
    %c0_i32 = arith.constant 0 : i32
    %c0_i32_0 = arith.constant 0 : i32
    %c0_i32_1 = arith.constant 0 : i32
    return %c0_i32, %c0_i32_0 : i32, i32
  }
  func.func @transform_3(%arg0: i32) -> (i32, i32) {
    %c0_i32 = arith.constant 0 : i32
    %c0_i32_0 = arith.constant 0 : i32
    %c0_i32_1 = arith.constant 0 : i32
    return %c0_i32, %c0_i32_0 : i32, i32
  }
  func.func @transform_4(%arg0: i32) -> (i32, i32) {
    %c0_i32 = arith.constant 0 : i32
    %c0_i32_0 = arith.constant 0 : i32
    %c0_i32_1 = arith.constant 0 : i32
    return %c0_i32, %c0_i32_0 : i32, i32
  }
  func.func @transform_5(%arg0: i32) -> (i32, i32) {
    %c0_i32 = arith.constant 0 : i32
    %c0_i32_0 = arith.constant 0 : i32
    %c0_i32_1 = arith.constant 0 : i32
    return %c0_i32, %c0_i32_0 : i32, i32
  }
  func.func @transform_6(%arg0: i32) -> (i32, i32) {
    %c0_i32 = arith.constant 0 : i32
    %c0_i32_0 = arith.constant 0 : i32
    return %c0_i32, %arg0 : i32, i32
  }
}

module attributes {stable_mosaic.version = 11 : i64} {
  func.func @_regressor_kernel(%arg0: memref<2x512xbf16, #tpu.memory_space<vmem>>, %arg1: memref<512x3xbf16, #tpu.memory_space<vmem>>, %arg2: memref<1x3xf32, #tpu.memory_space<vmem>>, %arg3: memref<2x3xf32, #tpu.memory_space<vmem>>) attributes {dimension_semantics = [], scalar_prefetch = 0 : i64, scratch_operands = 0 : i64, tpu.core_type = #tpu.core_type<tc>} {
    %c0 = arith.constant 0 : index
    %c0_0 = arith.constant 0 : index
    %0 = vector.load %arg0[%c0, %c0_0] : memref<2x512xbf16, #tpu.memory_space<vmem>>, vector<2x512xbf16>
    %c0_1 = arith.constant 0 : index
    %c0_2 = arith.constant 0 : index
    %1 = vector.load %arg1[%c0_1, %c0_2] : memref<512x3xbf16, #tpu.memory_space<vmem>>, vector<512x3xbf16>
    %cst = arith.constant dense<0.000000e+00> : vector<2x3xf32>
    %2 = tpu.matmul %0, %1, %cst {dimension_numbers = #tpu.dot_dimension_numbers<[1], [0], [0], [1], [0, 0, 1, 1], [], []>} : vector<2x512xbf16>, vector<512x3xbf16>, vector<2x3xf32> -> vector<2x3xf32>
    %c0_3 = arith.constant 0 : index
    %c0_4 = arith.constant 0 : index
    %3 = vector.load %arg2[%c0_3, %c0_4] : memref<1x3xf32, #tpu.memory_space<vmem>>, vector<1x3xf32>
    %4 = vector.broadcast %3 : vector<1x3xf32> to vector<2x3xf32>
    %5 = arith.addf %2, %4 : vector<2x3xf32>
    %6 = arith.mulf %5, %5 : vector<2x3xf32>
    %cst_5 = arith.constant dense<0.000000e+00> : vector<2xf32>
    %7 = vector.multi_reduction <add>, %6, %cst_5 [1] : vector<2x3xf32> to vector<2xf32>
    %8 = vector.shape_cast %7 : vector<2xf32> to vector<2x1xf32>
    %cst_6 = arith.constant 1.000000e-24 : f32
    %9 = vector.broadcast %cst_6 : f32 to vector<2x1xf32>
    %10 = arith.maximumf %8, %9 : vector<2x1xf32>
    %11 = math.rsqrt %10 : vector<2x1xf32>
    %12 = vector.broadcast %11 : vector<2x1xf32> to vector<2x3xf32>
    %13 = arith.mulf %5, %12 : vector<2x3xf32>
    %c0_7 = arith.constant 0 : index
    %c0_8 = arith.constant 0 : index
    %14 = vector.load %arg3[%c0_7, %c0_8] : memref<2x3xf32, #tpu.memory_space<vmem>>, vector<2x3xf32>
    tpu.vector_store %arg3[%c0_7, %c0_8], %13 {strides = array<i32>} : memref<2x3xf32, #tpu.memory_space<vmem>>, vector<2x3xf32>,
    return
  }
}

</mosaic_0001>

<bundles_post_ra>
// kernel: densenet_upright_forward.11
= control target key start
LH: loop header
LB: loop body
LE: loop exit
PB: predicated region body
PF: predicated region fallthrough
CT: control target
= control target key end

     0   :  { %s791_s15 = smov 0   ;;  %s793_s16 = smov 0   ;;  %s936_s0 = inlined_call_operand.vmem [shape: bf16[16,147], index: 0, kind: input, shape index: {}]   ;;  %s937_s1 = inlined_call_operand.vmem [shape: bf16[147,512], index: 1, kind: input, shape index: {}]   ;;  %s938_s2 = inlined_call_operand.vmem [shape: f32[16,1], index: 2, kind: input, shape index: {}]   ;;  %s939_s3 = inlined_call_operand.vmem [shape: f32[16,1], index: 3, kind: input, shape index: {}]   ;;  %s940_s4 = inlined_call_operand.vmem [shape: bf16[16,512], index: 4, kind: output, shape index: {}]  }
   0x1   :  { %s795_s17 = smov 0  }
   0x2 LB: > { %s636_s18 = sadd.s32 4294967295, %s762_s17   ;;  %s808_s19 = sadd.s32 1, %s762_s17   ;;  %s762_s17 = sphi %s795_s17, %s944_s17   ;;  %s758_s16 = sphi %s793_s16, %s943_s16   ;;  %s754_s15 = sphi %s791_s15, %s942_s15  }
   0x3   : > { %s39_s20 = ssub.s32 %s762_s17, %s808_s19  ;;  %s42_s21 = sadd.s32 1, %s758_s16 }
   0x4   : > { %p40_p0 = scmp.eq.s32.totalorder %s39_s20, 0  ;;  %p49_p1 = scmp.ne.s32.totalorder %s758_s16, %s754_s15 }
   0x5   : > { %p50_p2 = scmp.eq.s32.totalorder %s762_s17, 0  ;;  %p121_p3 = scmp.eq.s32.totalorder %s636_s18, 1 }
   0x6   : > { %s819_s22 = scalar_select %p40_p0, %s758_s16, %s42_s21  }
   0x7   : > { %p51_p4 = por %p50_p2, %p49_p1  ;;  %p821_p5 = por %p121_p3, %p49_p1 }
   0x8   : > { %p639_p6 = scmp.ge.s32.totalorder %s762_s17, 2 }
   0xa   : > { %152 = sbr.rel (%p639_p6) target bundleno = 31 (0x1f), region = 28 }
  0x11   : > { %155 = sbr.rel (!%p51_p4) target bundleno = 31 (0x1f), region = 32  ;;  %s157_s24 = sand.u32 (%p51_p4), 1, %s758_s16  }
  0x12   : > { %s674_s25 = sshll.u32 (%p51_p4), %s762_s17, 3  ;;  %s678_s26 = smul.u32 (%p51_p4), 152, %s157_s24 }
  0x13   : > { %s831_s29 = scalar_lea.vmem (%p51_p4), %s937_s1, %s674_s25 }
  0x14   : > { %v226_v0 = vld [vmem:[%s831_s29] sm:$0xff] (%p51_p4)  ;;  %v228_v1 = vld [vmem:[%s831_s29 + $0x10] sm:$0xff] (%p51_p4)  ;;  %s839_s30 = scalar_lea.vmem (%p51_p4), [#allocation2], %s678_s26 }
  0x15   : > { %v230_v2 = vld [vmem:[%s831_s29 + $0x20] sm:$0xff] (%p51_p4)  ;;  %v232_v3 = vld [vmem:[%s831_s29 + $0x30] sm:$0xff] (%p51_p4)  ;;  %227 = vst [vmem:[%s839_s30] sm:$0xff] (%p51_p4), %v226_v0  ;;  %229 = vst [vmem:[%s839_s30 + $0x8] sm:$0xff] (%p51_p4), %v228_v1 }
  0x16   : > { %v234_v4 = vld [vmem:[%s831_s29 + $0x40] sm:$0xff] (%p51_p4)  ;;  %v236_v5 = vld [vmem:[%s831_s29 + $0x50] sm:$0xff] (%p51_p4)  ;;  %231 = vst [vmem:[%s839_s30 + $0x10] sm:$0xff] (%p51_p4), %v230_v2  ;;  %233 = vst [vmem:[%s839_s30 + $0x18] sm:$0xff] (%p51_p4), %v232_v3 }
  0x17   : > { %235 = vst [vmem:[%s839_s30 + $0x20] sm:$0xff] (%p51_p4), %v234_v4  ;;  %237 = vst [vmem:[%s839_s30 + $0x28] sm:$0xff] (%p51_p4), %v236_v5  ;;  %v238_v6 = vld [vmem:[%s831_s29 + $0x60] sm:$0xff] (%p51_p4)  ;;  %v240_v7 = vld [vmem:[%s831_s29 + $0x70] sm:$0xff] (%p51_p4) }
  0x18   : > { %v242_v8 = vld [vmem:[%s831_s29 + $0x80] sm:$0xff]  ;;  %239 = vst [vmem:[%s839_s30 + $0x30] sm:$0xff] %v238_v6  ;;  %241 = vst [vmem:[%s839_s30 + $0x38] sm:$0xff] %v240_v7  ;;  %v244_v9 = vld [vmem:[%s831_s29 + $0x90] sm:$0xff] }
  0x19   : > { %243 = vst [vmem:[%s839_s30 + $0x40] sm:$0xff] %v242_v8  ;;  %v246_v10 = vld [vmem:[%s831_s29 + $0xa0] sm:$0xff]  ;;  %v248_v11 = vld [vmem:[%s831_s29 + $0xb0] sm:$0xff]  ;;  %245 = vst [vmem:[%s839_s30 + $0x48] sm:$0xff] %v244_v9 }
  0x1a   : > { %247 = vst [vmem:[%s839_s30 + $0x50] sm:$0xff] %v246_v10  ;;  %249 = vst [vmem:[%s839_s30 + $0x58] sm:$0xff] %v248_v11  ;;  %v250_v12 = vld [vmem:[%s831_s29 + $0xc0] sm:$0xff]  ;;  %v252_v13 = vld [vmem:[%s831_s29 + $0xd0] sm:$0xff] }
  0x1b   : > { %v254_v14 = vld [vmem:[%s831_s29 + $0xe0] sm:$0xff]  ;;  %251 = vst [vmem:[%s839_s30 + $0x60] sm:$0xff] %v250_v12  ;;  %253 = vst [vmem:[%s839_s30 + $0x68] sm:$0xff] %v252_v13  ;;  %v256_v15 = vld [vmem:[%s831_s29 + $0xf0] sm:$0xff] }
  0x1c   : > { %255 = vst [vmem:[%s839_s30 + $0x70] sm:$0xff] %v254_v14  ;;  %v258_v16 = vld [vmem:[%s831_s29 + $0x100] sm:$0xff]  ;;  %v260_v17 = vld [vmem:[%s831_s29 + $0x110] sm:$0xff]  ;;  %257 = vst [vmem:[%s839_s30 + $0x78] sm:$0xff] %v256_v15 }
  0x1d   : > { %259 = vst [vmem:[%s839_s30 + $0x80] sm:$0xff] %v258_v16  ;;  %261 = vst [vmem:[%s839_s30 + $0x88] sm:$0xff] %v260_v17  ;;  %v262_v18 = vld [vmem:[%s831_s29 + $0x120] sm:$0xff] }
  0x1e   : > { %263 = vst [vmem:[%s839_s30 + $0x90] sm:$0xff] %v262_v18 }
  0x1f PF: > { %p642_p7 = scmp.ge.s32.totalorder %s762_s17, 1  ;;  %p268_p8 = scmp.lt.s32.totalorder %s762_s17, 3 }
  0x21   : > { %p269_p9 = pnand %p642_p7, %p268_p8 }
  0x22   : > { %s275_s5 = sand.u32 (!%p269_p9), 1, %s754_s15   ;;  %v739_v19 = vld [vmem:[%s936_s0 + $0x4] ss:$8 sps:$4 sm:$0xff] (!%p269_p9)   ;;  %vm427_vm0 = vcmask (!%p269_p9), 154624   ;;  %v764_v22 = vmov (!%p269_p9), 0   ;;  %vm431_vm1 = vcmask (!%p269_p9), 1040384  }
  0x23   : > { %272 = sbr.rel (%p269_p9) target bundleno = 312 (0x138), region = 70  ;;  %v484_v20 = vld [vmem:[%s938_s2] sm:$0xff] (!%p269_p9)  ;;  %666 = vmatprep.mubr.msk.bf16.mxu0 (!%p269_p9), %vm427_vm0, %v739_v19  ;;  %706 = vset.pattern.permute.xlu0 (!%p269_p9), %v764_v22  ;;  %v485_v23 = vld [vmem:[%s938_s2 + $0x8] sm:$0xff] (!%p269_p9)  ;;  %vm432_vm2 = vcmask (!%p269_p9), 1041408   ;;  %v765_v41 = vmov (!%p269_p9), 65535   ;;  %s643_s27 = sshll.u32 (!%p269_p9), %s275_s5, 4 }
  0x24   : > { %s679_s6 = smul.u32 (!%p269_p9), 152, %s275_s5  ;;  %v500_v21 = vld [vmem:[%s939_s3] sm:$0xff] (!%p269_p9)  ;;  %488 = vperm.xlu0 (!%p269_p9), %706, %v484_v20   ;;  %707 = vset.pattern.permute.xlu1 (!%p269_p9), %v764_v22  ;;  %v501_v27 = vld [vmem:[%s939_s3 + $0x8] sm:$0xff] (!%p269_p9)  ;;  %v433_v42 = vsel (!%p269_p9), %vm431_vm1, 4294967295, %v765_v41  ;;  %s298_s28 = scalar_lea.vmem (!%p269_p9), [#allocation3], %s643_s27 }
  0x25   : > { %504 = vperm.xlu1 (!%p269_p9), %707, %v500_v21   ;;  %v434_v46 = vsel (!%p269_p9), %vm432_vm2, %v433_v42, 0  ;;  %v737_v51 = vld [vmem:[%s936_s0] ss:$8 sps:$4 sm:$0xff] (!%p269_p9)  }
  0x26   : > { %s890_s20 = scalar_lea.vmem (!%p269_p9), [#allocation2], %s679_s6 }
  0x27   : > { %v708_v24 = vld [vmem:[%s890_s20 + $0x4] ss:$8 sps:$4 sm:$0xff] (!%p269_p9)   ;;  %v710_v25 = vld [vmem:[%s890_s20] ss:$8 sps:$4 sm:$0xff] (!%p269_p9)   ;;  %v711_v26 = vld [vmem:[%s890_s20 + $0x14] ss:$8 sps:$4 sm:$0xff] (!%p269_p9)  }
  0x28   : > { %441 = vmatprep.subr.bf16.mxu0 (!%p269_p9), %v708_v24  ;;  %v713_v28 = vld [vmem:[%s890_s20 + $0x10] ss:$8 sps:$4 sm:$0xff] (!%p269_p9)   ;;  %v714_v29 = vld [vmem:[%s890_s20 + $0x24] ss:$8 sps:$4 sm:$0xff] (!%p269_p9)   ;;  %493 = vperm.xlu0 (!%p269_p9), %706, %v485_v23   ;;  %v716_v30 = vld [vmem:[%s890_s20 + $0x20] ss:$8 sps:$4 sm:$0xff] (!%p269_p9)  }
  0x29   : > { %442 = vmatpush1.bf16.msra.mxu0 (!%p269_p9), %v710_v25  ;;  %509 = vperm.xlu1 (!%p269_p9), %707, %v501_v27   ;;  %v717_v31 = vld [vmem:[%s890_s20 + $0x34] ss:$8 sps:$4 sm:$0xff] (!%p269_p9)   ;;  %v719_v32 = vld [vmem:[%s890_s20 + $0x30] ss:$8 sps:$4 sm:$0xff] (!%p269_p9)   ;;  %v720_v33 = vld [vmem:[%s890_s20 + $0x44] ss:$8 sps:$4 sm:$0xff] (!%p269_p9)  }
  0x2a   : > { %443 = vmatprep.subr.bf16.mxu0 %v711_v26  ;;  %v722_v34 = vld [vmem:[%s890_s20 + $0x40] ss:$8 sps:$4 sm:$0xff]   ;;  %v723_v35 = vld [vmem:[%s890_s20 + $0x54] ss:$8 sps:$4 sm:$0xff]   ;;  %v725_v36 = vld [vmem:[%s890_s20 + $0x50] ss:$8 sps:$4 sm:$0xff]  }
  0x2b   : > { %v726_v37 = vld [vmem:[%s890_s20 + $0x64] ss:$8 sps:$4 sm:$0xff]   ;;  %v728_v38 = vld [vmem:[%s890_s20 + $0x60] ss:$8 sps:$4 sm:$0xff]   ;;  %v729_v39 = vld [vmem:[%s890_s20 + $0x74] ss:$8 sps:$4 sm:$0xff]  }
  0x2c   : > { %v320_v40 = vld [vmem:[%s890_s20 + $0x90] sm:$0x33]  ;;  %v732_v44 = vld [vmem:[%s890_s20 + $0x84] ss:$8 sps:$4 sm:$0xff]   ;;  %v734_v47 = vld [vmem:[%s890_s20 + $0x80] ss:$8 sps:$4 sm:$0xff]  }
  0x2d   : > { %444 = vmatpush1.bf16.msra.mxu0 %v713_v28  ;;  %v731_v43 = vld [vmem:[%s890_s20 + $0x70] ss:$8 sps:$4 sm:$0xff]   ;;  %v665_v45 = vcombine.high %v320_v40, %v320_v40  ;;  %v664_v48 = vcombine.low %v320_v40, %v320_v40  ;;  %s677_s15 = sshll.u32 (%p821_p5), %s636_s18, 3 }
  0x2e   : > { %445 = vmatprep.subr.bf16.mxu0 %v714_v29  ;;  %s543_s5 = scalar_lea.vmem (%p821_p5), %s940_s4, %s677_s15 }
  0x2f   : > { %v439_v49 = vand.u32 %v665_v45, %v434_v46  ;;  %v436_v50 = vand.u32 %v664_v48, %v434_v46 }
  0x31   : > { %446 = vmatpush1.bf16.msra.mxu0 %v716_v30 }
  0x32   : > { %447 = vmatprep.subr.bf16.mxu0 %v717_v31 }
  0x35   : > { %448 = vmatpush1.bf16.msra.mxu0 %v719_v32 }
  0x36   : > { %449 = vmatprep.subr.bf16.mxu0 %v720_v33 }
  0x39   : > { %450 = vmatpush1.bf16.msra.mxu0 %v722_v34 }
  0x3a   : > { %451 = vmatprep.subr.bf16.mxu0 %v723_v35 }
  0x3d   : > { %452 = vmatpush1.bf16.msra.mxu0 %v725_v36 }
  0x3e   : > { %453 = vmatprep.subr.bf16.mxu0 %v726_v37 }
  0x41   : > { %454 = vmatpush1.bf16.msra.mxu0 %v728_v38 }
  0x42   : > { %455 = vmatprep.subr.bf16.mxu0 %v729_v39 }
  0x45   : > { %456 = vmatpush1.bf16.msra.mxu0 %v731_v43 }
  0x46   : > { %457 = vmatprep.subr.bf16.mxu0 %v732_v44 }
  0x49   : > { %458 = vmatpush1.bf16.msra.mxu0 %v734_v47 }
  0x4a   : > { %459 = vmatprep.subr.bf16.mxu0 %v439_v49 }
  0x4d   : > { %460 = vmatpush1.bf16.msra.mxu0 %v436_v50 }
  0x50   : > { %474 = vmatmul.mubr.bf16.vlgmr.msra.gmra.mrb[0].mxu0 %v737_v51 }
  0xa3   : > { %v489_v52 = vpop.permute.xlu0 %488 }
  0xa4   : > { %v505_v53 = vpop.permute.xlu1 %504 }
  0xa7   : > { %v494_v57 = vpop.permute.xlu0 %493 }
  0xa8   : > { %v510_v63 = vpop.permute.xlu1 %509 }
 0x123   : > { %v475_v54 = vpop.f32.mrb[0].mxu0 }
 0x124   : > { %v496_v55 = vmul.f32 %v489_v52, %v475_v54  ;;  %v477_v56 = vpop.f32.mrb[1].mxu0 }
 0x125   : > { %v497_v58 = vmul.f32 %v489_v52, %v477_v56  ;;  %v479_v59 = vpop.f32.mrb[2].mxu0 }
 0x126   : > { %v512_v60 = vadd.f32 %v505_v53, %v496_v55  ;;  %v498_v61 = vmul.f32 %v494_v57, %v479_v59  ;;  %v481_v62 = vpop.f32.mrb[3].mxu0 }
 0x127   : > { %v513_v0 = vadd.f32 %v505_v53, %v497_v58  ;;  %v499_v1 = vmul.f32 %v494_v57, %v481_v62 }
 0x128   : > { %v516_v2 = vmax.f32 %v512_v60, 0.0  ;;  %v514_v3 = vadd.f32 %v510_v63, %v498_v61 }
 0x129   : > { %v517_v4 = vmax.f32 %v513_v0, 0.0  ;;  %v515_v5 = vadd.f32 %v510_v63, %v499_v1  ;;  %540 = sbr.rel (!%p821_p5) target bundleno = 312 (0x138), region = 78 }
 0x12a   : > { %v518_v6 = vmax.f32 %v514_v3, 0.0 }
 0x12b   : > { %v675_v7 = vpack.c.bf16 %v517_v4, %v516_v2  ;;  %v519_v8 = vmax.f32 %v515_v5, 0.0 }
 0x12d   : > { %532 = vst [vmem:[%s298_s28] sm:$0xff] %v675_v7  ;;  %v676_v9 = vpack.c.bf16 %v519_v8, %v518_v6 }
 0x12f   : > { %533 = vst [vmem:[%s298_s28 + $0x8] sm:$0xff] %v676_v9 }
 0x134   : > { %v573_v10 = vld [vmem:[%s298_s28] sm:$0xff] }
 0x135   : > { %574 = vst [vmem:[%s543_s5] sm:$0xff] %v573_v10 }
 0x136   : > { %v575_v11 = vld [vmem:[%s298_s28 + $0x8] sm:$0xff] }
 0x137   : > { %576 = vst [vmem:[%s543_s5 + $0x10] sm:$0xff] %v575_v11 }
 0x138 PF: > { %p11_p10 = scmp.ge.s32.totalorder %s808_s19, 4   ;;  %s942_s15 = smov %s758_s16 }
 0x139   : > { %s943_s16 = smov %s819_s22  ;;  %s944_s17 = smov %s808_s19 }
 0x13a   :  { %13 = sbr.rel (!%p11_p10) target bundleno = 2 (0x2), region = 147 }

// kernel: densenet_upright_forward.12
= control target key start
LH: loop header
LB: loop body
LE: loop exit
PB: predicated region body
PF: predicated region fallthrough
CT: control target
= control target key end

     0   :  { %v254_v0 = vmov 0   ;;  %vm73_vm0 = vcmask 130048   ;;  %s343_s3 = inlined_call_operand.vmem [shape: f32[16,1], index: 3, kind: input, shape index: {}]   ;;  %s344_s2 = inlined_call_operand.vmem [shape: f32[16,1], index: 2, kind: input, shape index: {}]   ;;  %s345_s4 = inlined_call_operand.vmem [shape: f32[32,1], index: 4, kind: input, shape index: {}]   ;;  %s346_s5 = inlined_call_operand.vmem [shape: f32[32,1], index: 5, kind: input, shape index: {}]   ;;  %s347_s0 = inlined_call_operand.vmem [shape: bf16[32,16], index: 0, kind: input, shape index: {}]   ;;  %s348_s1 = inlined_call_operand.vmem [shape: bf16[16,128], index: 1, kind: input, shape index: {}]   ;;  %s349_s6 = inlined_call_operand.vmem [shape: bf16[32,128], index: 6, kind: output, shape index: {}]  }
   0x1   :  { %251 = vset.pattern.permute.xlu1 %v254_v0  ;;  %250 = vset.pattern.permute.xlu0 %v254_v0  ;;  %v42_v1 = vld [vmem:[%s343_s3] sm:$0xff]  ;;  %v43_v3 = vld [vmem:[%s343_s3 + $0x8] sm:$0xff]  ;;  %v132_v7 = vld [vmem:[%s345_s4 + $0x18] sm:$0xff] }
   0x2   :  { %v28_v2 = vld [vmem:[%s344_s2] sm:$0xff]  ;;  %46 = vperm.xlu1 %251, %v42_v1   ;;  %v29_v4 = vld [vmem:[%s344_s2 + $0x8] sm:$0xff]  ;;  %v131_v8 = vld [vmem:[%s345_s4 + $0x10] sm:$0xff] }
   0x3   :  { %32 = vperm.xlu0 %250, %v28_v2   ;;  %v130_v5 = vld [vmem:[%s345_s4 + $0x8] sm:$0xff]  ;;  %v129_v6 = vld [vmem:[%s345_s4] sm:$0xff]  ;;  %v160_v12 = vld [vmem:[%s346_s5 + $0x18] sm:$0xff] }
   0x4   :  { %v158_v9 = vld [vmem:[%s346_s5 + $0x8] sm:$0xff]  ;;  %v157_v10 = vld [vmem:[%s346_s5] sm:$0xff]  ;;  %v159_v13 = vld [vmem:[%s346_s5 + $0x10] sm:$0xff] }
   0x5   :  { %v252_v11 = vld [vmem:[%s347_s0] sm:$0xff]   ;;  %v253_v28 = vld [vmem:[%s347_s0 + $0x8] sm:$0xff]  }
   0x6   :  { %51 = vperm.xlu1 %251, %v43_v3   ;;  %245 = vmatprep.mubr.msk.bf16.mxu0 %vm73_vm0, %v252_v11  ;;  %v226_v14 = vld [vmem:[%s348_s1] sm:$0xff]  }
   0x7   :  { %37 = vperm.xlu0 %250, %v29_v4   ;;  %v227_v15 = vunpack.c.l.bf16 %v226_v14  ;;  %v228_v19 = vunpack.c.h.bf16 %v226_v14 }
   0xa   :  { %140 = vperm.xlu1 %251, %v130_v5  }
   0xb   :  { %135 = vperm.xlu0 %250, %v129_v6  }
   0xe   :  { %150 = vperm.xlu1 %251, %v132_v7  }
   0xf   :  { %145 = vperm.xlu0 %250, %v131_v8  }
  0x12   :  { %168 = vperm.xlu1 %251, %v158_v9  }
  0x13   :  { %163 = vperm.xlu0 %250, %v157_v10  }
  0x16   :  { %178 = vperm.xlu1 %251, %v160_v12  }
  0x17   :  { %173 = vperm.xlu0 %250, %v159_v13  }
  0x81   :  { %v47_v16 = vpop.permute.xlu1 %46 }
  0x82   :  { %v33_v17 = vpop.permute.xlu0 %32 }
  0x83   :  { %v40_v18 = vmul.f32 %v227_v15, %v33_v17 }
  0x85   :  { %v54_v21 = vadd.f32 %v47_v16, %v40_v18  ;;  %v52_v23 = vpop.permute.xlu1 %51 }
  0x86   :  { %v38_v20 = vpop.permute.xlu0 %37 }
  0x87   :  { %v41_v22 = vmul.f32 %v228_v19, %v38_v20  ;;  %v56_v25 = vmax.f32 %v54_v21, 0.0 }
  0x89   :  { %v55_v24 = vadd.f32 %v52_v23, %v41_v22  ;;  %v141_v30 = vpop.permute.xlu1 %140 }
  0x8a   :  { %v136_v29 = vpop.permute.xlu0 %135 }
  0x8b   :  { %v57_v26 = vmax.f32 %v55_v24, 0.0 }
  0x8d   :  { %v58_v27 = vpack.c.bf16 %v57_v26, %v56_v25  ;;  %v151_v32 = vpop.permute.xlu1 %150 }
  0x8e   :  { %v146_v31 = vpop.permute.xlu0 %145 }
  0x8f   :  { %243 = vmatprep.subr.bf16.mxu0 %v58_v27 }
  0x90   :  { %244 = vmatpush3.bf16.msra.mxu0 %v58_v27 }
  0x91   :  { %v169_v34 = vpop.permute.xlu1 %168 }
  0x92   :  { %v164_v33 = vpop.permute.xlu0 %163 }
  0x93   :  { %246 = vmatmul.mubr.msk.bf16.vlgmr.msra.gmra.mrb[0].mxu0 %vm73_vm0, %v253_v28 }
  0x95   :  { %v179_v44 = vpop.permute.xlu1 %178 }
  0x96   :  { %v174_v38 = vpop.permute.xlu0 %173 }
 0x166   :  { %v247_v35 = vpop.f32.mrb[0].mxu0 }
 0x167   :  { %v155_v36 = vmul.f32 %v247_v35, %v146_v31  ;;  %v114_v37 = vpop.f32.mrb[1].mxu0 }
 0x168   :  { %v153_v39 = vmul.f32 %v136_v29, %v114_v37  ;;  %v248_v40 = vpop.f32.mrb[2].mxu0 }
 0x169   :  { %v183_v41 = vadd.f32 %v174_v38, %v155_v36  ;;  %v156_v42 = vmul.f32 %v248_v40, %v151_v32  ;;  %v117_v43 = vpop.f32.mrb[3].mxu0 }
 0x16a   :  { %v181_v45 = vadd.f32 %v164_v33, %v153_v39  ;;  %v154_v46 = vmul.f32 %v141_v30, %v117_v43 }
 0x16b   :  { %v184_v47 = vadd.f32 %v179_v44, %v156_v42  ;;  %v187_v49 = vmax.f32 %v183_v41, 0.0 }
 0x16c   :  { %v182_v48 = vadd.f32 %v169_v34, %v154_v46  ;;  %v185_v51 = vmax.f32 %v181_v45, 0.0 }
 0x16d   :  { %v188_v50 = vmax.f32 %v184_v47, 0.0 }
 0x16e   :  { %v186_v52 = vmax.f32 %v182_v48, 0.0 }
 0x16f   :  { %v237_v53 = vpack.c.bf16 %v188_v50, %v187_v49 }
 0x170   :  { %v232_v54 = vpack.c.bf16 %v186_v52, %v185_v51 }
 0x171   :  { %239 = vst [vmem:[%s349_s6 + $0x8] sm:$0xff] %v237_v53  }
 0x172   :  { %233 = vst [vmem:[%s349_s6] sm:$0xff] %v232_v54  }

// kernel: densenet_upright_forward.14
= control target key start
LH: loop header
LB: loop body
LE: loop exit
PB: predicated region body
PF: predicated region fallthrough
CT: control target
= control target key end

     0   :  { %v280_v0 = vmov 0   ;;  %vm91_vm0 = vcmask 195584   ;;  %vm98_vm1 = vcmask 1043456   ;;  %s378_s3 = inlined_call_operand.vmem [shape: f32[24,1], index: 3, kind: input, shape index: {}]   ;;  %s379_s2 = inlined_call_operand.vmem [shape: f32[24,1], index: 2, kind: input, shape index: {}]   ;;  %s380_s4 = inlined_call_operand.vmem [shape: f32[32,1], index: 4, kind: input, shape index: {}]   ;;  %s381_s5 = inlined_call_operand.vmem [shape: f32[32,1], index: 5, kind: input, shape index: {}]   ;;  %s382_s0 = inlined_call_operand.vmem [shape: bf16[32,24], index: 0, kind: input, shape index: {}]   ;;  %s383_s1 = inlined_call_operand.vmem [shape: bf16[24,128], index: 1, kind: input, shape index: {}]   ;;  %s384_s6 = inlined_call_operand.vmem [shape: bf16[32,128], index: 6, kind: output, shape index: {}]  }
   0x1   :  { %277 = vset.pattern.permute.xlu1 %v280_v0  ;;  %276 = vset.pattern.permute.xlu0 %v280_v0  ;;  %v51_v1 = vld [vmem:[%s378_s3] sm:$0xff]  ;;  %v52_v3 = vld [vmem:[%s378_s3 + $0x8] sm:$0xff]  ;;  %v53_v5 = vld [vmem:[%s378_s3 + $0x10] sm:$0xff] }
   0x2   :  { %v30_v2 = vld [vmem:[%s379_s2] sm:$0xff]  ;;  %56 = vperm.xlu1 %277, %v51_v1   ;;  %v31_v4 = vld [vmem:[%s379_s2 + $0x8] sm:$0xff]  ;;  %v32_v6 = vld [vmem:[%s379_s2 + $0x10] sm:$0xff] }
   0x3   :  { %35 = vperm.xlu0 %276, %v30_v2   ;;  %v152_v7 = vld [vmem:[%s380_s4 + $0x8] sm:$0xff]  ;;  %v151_v8 = vld [vmem:[%s380_s4] sm:$0xff]  ;;  %v154_v9 = vld [vmem:[%s380_s4 + $0x18] sm:$0xff] }
   0x4   :  { %v153_v10 = vld [vmem:[%s380_s4 + $0x10] sm:$0xff]  ;;  %v180_v11 = vld [vmem:[%s381_s5 + $0x8] sm:$0xff]  ;;  %v179_v12 = vld [vmem:[%s381_s5] sm:$0xff] }
   0x5   :  { %v278_v13 = vld [vmem:[%s382_s0] sm:$0xff]   ;;  %v182_v14 = vld [vmem:[%s381_s5 + $0x18] sm:$0xff]  ;;  %v181_v15 = vld [vmem:[%s381_s5 + $0x10] sm:$0xff] }
   0x6   :  { %61 = vperm.xlu1 %277, %v52_v3   ;;  %270 = vmatprep.mubr.msk.bf16.mxu0 %vm91_vm0, %v278_v13  ;;  %v248_v16 = vld [vmem:[%s383_s1] sm:$0xff]   ;;  %v26_v22 = vld [vmem:[%s383_s1 + $0x8] sm:$0xf] }
   0x7   :  { %40 = vperm.xlu0 %276, %v31_v4   ;;  %v249_v17 = vunpack.c.l.bf16 %v248_v16  ;;  %v250_v21 = vunpack.c.h.bf16 %v248_v16  ;;  %v29_v27 = vunpack.c.l.bf16 %v26_v22  ;;  %v279_v39 = vld [vmem:[%s382_s0 + $0x8] sm:$0xff]  }
   0xa   :  { %66 = vperm.xlu1 %277, %v53_v5  }
   0xb   :  { %45 = vperm.xlu0 %276, %v32_v6  }
   0xe   :  { %162 = vperm.xlu1 %277, %v152_v7  }
   0xf   :  { %157 = vperm.xlu0 %276, %v151_v8  }
  0x12   :  { %172 = vperm.xlu1 %277, %v154_v9  }
  0x13   :  { %167 = vperm.xlu0 %276, %v153_v10  }
  0x16   :  { %190 = vperm.xlu1 %277, %v180_v11  }
  0x17   :  { %185 = vperm.xlu0 %276, %v179_v12  }
  0x1a   :  { %200 = vperm.xlu1 %277, %v182_v14  }
  0x1b   :  { %195 = vperm.xlu0 %276, %v181_v15  }
  0x81   :  { %v57_v18 = vpop.permute.xlu1 %56 }
  0x82   :  { %v36_v19 = vpop.permute.xlu0 %35 }
  0x83   :  { %v48_v20 = vmul.f32 %v249_v17, %v36_v19 }
  0x85   :  { %v62_v23 = vpop.permute.xlu1 %61  ;;  %v69_v25 = vadd.f32 %v57_v18, %v48_v20 }
  0x86   :  { %v41_v24 = vpop.permute.xlu0 %40 }
  0x87   :  { %v49_v26 = vmul.f32 %v250_v21, %v41_v24  ;;  %v72_v30 = vmax.f32 %v69_v25, 0.0 }
  0x89   :  { %v70_v28 = vadd.f32 %v62_v23, %v49_v26  ;;  %v67_v33 = vpop.permute.xlu1 %66 }
  0x8a   :  { %v46_v29 = vpop.permute.xlu0 %45 }
  0x8b   :  { %v73_v31 = vmax.f32 %v70_v28, 0.0  ;;  %v50_v32 = vmul.f32 %v46_v29, %v29_v27 }
  0x8d   :  { %v71_v34 = vadd.f32 %v67_v33, %v50_v32  ;;  %v75_v35 = vpack.c.bf16 %v73_v31, %v72_v30  ;;  %v163_v41 = vpop.permute.xlu1 %162 }
  0x8e   :  { %v158_v40 = vpop.permute.xlu0 %157 }
  0x8f   :  { %v74_v36 = vmax.f32 %v71_v34, 0.0  ;;  %266 = vmatprep.subr.bf16.mxu0 %v75_v35 }
  0x90   :  { %267 = vmatpush3.bf16.msra.mxu0 %v75_v35 }
  0x91   :  { %v76_v37 = vpack.c.bf16 %v74_v36, %v74_v36  ;;  %v173_v43 = vpop.permute.xlu1 %172 }
  0x92   :  { %v168_v42 = vpop.permute.xlu0 %167 }
  0x93   :  { %274 = vmatprep.subr.msk.bf16.mxu0 %vm98_vm1, %v76_v37  ;;  %v100_v38 = vsel %vm98_vm1, %v76_v37, 0 }
  0x94   :  { %269 = vmatpush3.bf16.msra.mxu0 %v100_v38 }
  0x95   :  { %v191_v45 = vpop.permute.xlu1 %190 }
  0x96   :  { %v186_v44 = vpop.permute.xlu0 %185 }
  0x97   :  { %271 = vmatmul.mubr.msk.bf16.vlgmr.msra.gmra.mrb[0].mxu0 %vm91_vm0, %v279_v39 }
  0x99   :  { %v201_v55 = vpop.permute.xlu1 %200 }
  0x9a   :  { %v196_v49 = vpop.permute.xlu0 %195 }
 0x16a   :  { %v272_v46 = vpop.f32.mrb[0].mxu0 }
 0x16b   :  { %v177_v47 = vmul.f32 %v272_v46, %v168_v42  ;;  %v136_v48 = vpop.f32.mrb[1].mxu0 }
 0x16c   :  { %v175_v50 = vmul.f32 %v158_v40, %v136_v48  ;;  %v273_v51 = vpop.f32.mrb[2].mxu0 }
 0x16d   :  { %v205_v52 = vadd.f32 %v196_v49, %v177_v47  ;;  %v178_v53 = vmul.f32 %v273_v51, %v173_v43  ;;  %v139_v54 = vpop.f32.mrb[3].mxu0 }
 0x16e   :  { %v203_v56 = vadd.f32 %v186_v44, %v175_v50  ;;  %v176_v57 = vmul.f32 %v163_v41, %v139_v54 }
 0x16f   :  { %v206_v58 = vadd.f32 %v201_v55, %v178_v53  ;;  %v209_v60 = vmax.f32 %v205_v52, 0.0 }
 0x170   :  { %v204_v59 = vadd.f32 %v191_v45, %v176_v57  ;;  %v207_v62 = vmax.f32 %v203_v56, 0.0 }
 0x171   :  { %v210_v61 = vmax.f32 %v206_v58, 0.0 }
 0x172   :  { %v208_v63 = vmax.f32 %v204_v59, 0.0 }
 0x173   :  { %v259_v0 = vpack.c.bf16 %v210_v61, %v209_v60 }
 0x174   :  { %v254_v1 = vpack.c.bf16 %v208_v63, %v207_v62 }
 0x175   :  { %261 = vst [vmem:[%s384_s6 + $0x8] sm:$0xff] %v259_v0  }
 0x176   :  { %255 = vst [vmem:[%s384_s6] sm:$0xff] %v254_v1  }

// kernel: densenet_upright_forward.13
= control target key start
LH: loop header
LB: loop body
LE: loop exit
PB: predicated region body
PF: predicated region fallthrough
CT: control target
= control target key end

     0   :  { %v336_v1 = vmov 0.0   ;;  %vm337_vm0 = vmmov 0   ;;  %vm168_vm1 = vcmask 261120   ;;  %s416_s1 = inlined_call_operand.vmem [shape: bf16[288,128], index: 1, kind: input, shape index: {}]   ;;  %s417_s0 = inlined_call_operand.vmem [shape: bf16[8,288], index: 0, kind: input, shape index: {}]   ;;  %s418_s2 = inlined_call_operand.vmem [shape: bf16[8,128], index: 2, kind: output, shape index: {}]  }
   0x1   :  { %v315_v0 = vld [vmem:[%s416_s1 + $0x40] sm:$0xff]   ;;  %305 = vmatprep.subr.bf16.mxu1 %v336_v1  ;;  %309 = vmatprep.mubr.msk.bf16.mxu1 %vm337_vm0, %v336_v1  ;;  %v317_v3 = vld [vmem:[%s416_s1 + $0x48] sm:$0xff]   ;;  %v319_v5 = vld [vmem:[%s416_s1 + $0x50] sm:$0xff]  }
   0x2   :  { %v316_v2 = vld [vmem:[%s416_s1] sm:$0xff]   ;;  %280 = vmatprep.subr.bf16.mxu0 %v315_v0  ;;  %v318_v4 = vld [vmem:[%s416_s1 + $0x8] sm:$0xff]   ;;  %v320_v6 = vld [vmem:[%s416_s1 + $0x10] sm:$0xff]  }
   0x3   :  { %281 = vmatpush3.bf16.msra.mxu0 %v316_v2  ;;  %v321_v7 = vld [vmem:[%s416_s1 + $0x58] sm:$0xff]   ;;  %v323_v9 = vld [vmem:[%s416_s1 + $0x60] sm:$0xff]   ;;  %v325_v12 = vld [vmem:[%s416_s1 + $0x68] sm:$0xff]  }
   0x4   :  { %282 = vmatprep.subr.bf16.mxu0 %v317_v3  ;;  %v322_v8 = vld [vmem:[%s416_s1 + $0x18] sm:$0xff]   ;;  %v329_v10 = vld [vmem:[%s416_s1 + $0x80] sm:$0xff]   ;;  %v332_v13 = vld [vmem:[%s416_s1 + $0x88] sm:$0xff]  }
   0x5   :  { %v324_v11 = vld [vmem:[%s416_s1 + $0x20] sm:$0xff]   ;;  %306 = vmatpush3.bf16.msra.mxu1 %v329_v10  ;;  %v326_v15 = vld [vmem:[%s416_s1 + $0x28] sm:$0xff]   ;;  %v327_v18 = vld [vmem:[%s416_s1 + $0x70] sm:$0xff]  }
   0x6   :  { %307 = vmatprep.subr.bf16.mxu1 %v336_v1  ;;  %v48_v14 = vld [vmem:[%s417_s0] sm:$0xff]  ;;  %v335_v17 = vld [vmem:[%s417_s0 + $0x8] ss:$0 sps:$4 sm:$0xff]   ;;  %v328_v19 = vld [vmem:[%s416_s1 + $0x30] sm:$0xff]  }
   0x7   :  { %283 = vmatpush3.bf16.msra.mxu0 %v318_v4  ;;  %v259_v16 = vcombine.high %v48_v14, %v48_v14  ;;  %v330_v20 = vld [vmem:[%s416_s1 + $0x78] sm:$0xff]   ;;  %v258_v22 = vcombine.low %v48_v14, %v48_v14 }
   0x8   :  { %284 = vmatprep.subr.bf16.mxu0 %v319_v5  ;;  %v331_v21 = vld [vmem:[%s416_s1 + $0x38] sm:$0xff]  }
   0x9   :  { %308 = vmatpush3.bf16.msra.mxu1 %v332_v13  ;;  %204 = vmatprep.mubr.bf16.mxu0 %v259_v16 }
   0xb   :  { %285 = vmatpush3.bf16.msra.mxu0 %v320_v6 }
   0xc   :  { %286 = vmatprep.subr.bf16.mxu0 %v321_v7  ;;  %310 = vmatmul.mubr.msk.bf16.vlgmr.msra.gmra.mrb[0].mxu1 %vm168_vm1, %v335_v17 }
   0xf   :  { %287 = vmatpush3.bf16.msra.mxu0 %v322_v8 }
  0x10   :  { %288 = vmatprep.subr.bf16.mxu0 %v323_v9 }
  0x13   :  { %289 = vmatpush3.bf16.msra.mxu0 %v324_v11 }
  0x14   :  { %290 = vmatprep.subr.bf16.mxu0 %v325_v12 }
  0x17   :  { %291 = vmatpush3.bf16.msra.mxu0 %v326_v15 }
  0x18   :  { %292 = vmatprep.subr.bf16.mxu0 %v327_v18 }
  0x1b   :  { %293 = vmatpush3.bf16.msra.mxu0 %v328_v19 }
  0x1c   :  { %294 = vmatprep.subr.bf16.mxu0 %v330_v20 }
  0x1f   :  { %295 = vmatpush3.bf16.msra.mxu0 %v331_v21 }
  0x22   :  { %205 = vmatmul.mubr.bf16.vlgmr.msra.gmra.mrb[0].mxu0 %v258_v22 }
  0xdf   :  { %v246_v23 = vpop.f32.mrb[0].mxu1 }
  0xe0   :  { %v311_v24 = vpop.f32.mrb[1].mxu1 }
  0xe1   :  { %v249_v25 = vpop.f32.mrb[2].mxu1 }
  0xe2   :  { %v312_v26 = vpop.f32.mrb[3].mxu1 }
  0xf5   :  { %v296_v27 = vpop.f32.mrb[0].mxu0 }
  0xf6   :  { %v297_v28 = vpop.f32.mrb[1].mxu0 }
  0xf7   :  { %v298_v29 = vadd.f32 %v297_v28, %v296_v27  ;;  %v299_v30 = vpop.f32.mrb[2].mxu0 }
  0xf8   :  { %v300_v31 = vpop.f32.mrb[3].mxu0 }
  0xf9   :  { %v247_v32 = vadd.f32 %v298_v29, %v246_v23 }
  0xfb   :  { %v252_v33 = vpack.c.bf16 %v247_v32, %v247_v32 }
  0xfd   :  { %253 = vst [vmem:[%s418_s2] sm:$0xf] %v252_v33 }

// kernel: densenet_upright_forward.16
= control target key start
LH: loop header
LB: loop body
LE: loop exit
PB: predicated region body
PF: predicated region fallthrough
CT: control target
= control target key end

     0   :  { %v191_v0 = vmov 0   ;;  %v192_v9 = vmov 0.0   ;;  %vm193_vm0 = vmmov 0   ;;  %vm95_vm1 = vcmask 261120   ;;  %s255_s3 = inlined_call_operand.vmem [shape: f32[32,1], index: 3, kind: input, shape index: {}]   ;;  %s256_s2 = inlined_call_operand.vmem [shape: f32[32,1], index: 2, kind: input, shape index: {}]   ;;  %s257_s0 = inlined_call_operand.vmem [shape: bf16[16,32], index: 0, kind: input, shape index: {}]   ;;  %s258_s1 = inlined_call_operand.vmem [shape: bf16[32,128], index: 1, kind: input, shape index: {}]   ;;  %s259_s4 = inlined_call_operand.vmem [shape: bf16[16,128], index: 4, kind: output, shape index: {}]  }
   0x1   :  { %189 = vset.pattern.permute.xlu1 %v191_v0  ;;  %188 = vset.pattern.permute.xlu0 %v191_v0  ;;  %v54_v1 = vld [vmem:[%s255_s3] sm:$0xff]  ;;  %v55_v3 = vld [vmem:[%s255_s3 + $0x8] sm:$0xff]  ;;  %v29_v5 = vld [vmem:[%s256_s2 + $0x18] sm:$0xff] }
   0x2   :  { %v26_v2 = vld [vmem:[%s256_s2] sm:$0xff]  ;;  %60 = vperm.xlu1 %189, %v54_v1   ;;  %v27_v4 = vld [vmem:[%s256_s2 + $0x8] sm:$0xff]  ;;  %v28_v6 = vld [vmem:[%s256_s2 + $0x10] sm:$0xff]  ;;  %177 = vmatprep.subr.bf16.mxu0 %v192_v9 }
   0x3   :  { %32 = vperm.xlu0 %188, %v26_v2   ;;  %v57_v7 = vld [vmem:[%s255_s3 + $0x18] sm:$0xff]  ;;  %v56_v8 = vld [vmem:[%s255_s3 + $0x10] sm:$0xff]  ;;  %181 = vmatprep.mubr.msk.bf16.mxu0 %vm193_vm0, %v192_v9  ;;  %v161_v10 = vld [vmem:[%s258_s1] sm:$0xff]  }
   0x4   :  { %v162_v11 = vunpack.c.l.bf16 %v161_v10  ;;  %v163_v15 = vunpack.c.h.bf16 %v161_v10  ;;  %v173_v18 = vld [vmem:[%s258_s1 + $0x8] sm:$0xff]   ;;  %v190_v38 = vld [vmem:[%s257_s0] sm:$0xff]  }
   0x5   :  { %v167_v22 = vunpack.c.h.bf16 %v173_v18  ;;  %v166_v23 = vunpack.c.l.bf16 %v173_v18 }
   0x6   :  { %65 = vperm.xlu1 %189, %v55_v3  }
   0x7   :  { %37 = vperm.xlu0 %188, %v27_v4  }
   0xa   :  { %47 = vperm.xlu1 %189, %v29_v5  }
   0xb   :  { %42 = vperm.xlu0 %188, %v28_v6  }
   0xe   :  { %75 = vperm.xlu1 %189, %v57_v7  }
   0xf   :  { %70 = vperm.xlu0 %188, %v56_v8  }
  0x81   :  { %v61_v12 = vpop.permute.xlu1 %60 }
  0x82   :  { %v33_v13 = vpop.permute.xlu0 %32 }
  0x83   :  { %v50_v14 = vmul.f32 %v162_v11, %v33_v13 }
  0x85   :  { %v66_v16 = vpop.permute.xlu1 %65  ;;  %v78_v19 = vadd.f32 %v61_v12, %v50_v14 }
  0x86   :  { %v38_v17 = vpop.permute.xlu0 %37 }
  0x87   :  { %v51_v20 = vmul.f32 %v163_v15, %v38_v17  ;;  %v82_v26 = vmax.f32 %v78_v19, 0.0 }
  0x89   :  { %v79_v21 = vadd.f32 %v66_v16, %v51_v20  ;;  %v48_v24 = vpop.permute.xlu1 %47 }
  0x8a   :  { %v43_v25 = vpop.permute.xlu0 %42  ;;  %v53_v28 = vmul.f32 %v167_v22, %v48_v24 }
  0x8b   :  { %v83_v27 = vmax.f32 %v79_v21, 0.0  ;;  %v52_v29 = vmul.f32 %v166_v23, %v43_v25 }
  0x8d   :  { %v86_v30 = vpack.c.bf16 %v83_v27, %v82_v26  ;;  %v76_v31 = vpop.permute.xlu1 %75 }
  0x8e   :  { %v71_v32 = vpop.permute.xlu0 %70  ;;  %v81_v33 = vadd.f32 %v76_v31, %v53_v28 }
  0x8f   :  { %v80_v34 = vadd.f32 %v71_v32, %v52_v29  ;;  %178 = vmatpush3.bf16.msra.mxu0 %v86_v30 }
  0x90   :  { %179 = vmatprep.subr.bf16.mxu0 %v192_v9  ;;  %v85_v35 = vmax.f32 %v81_v33, 0.0 }
  0x91   :  { %v84_v36 = vmax.f32 %v80_v34, 0.0 }
  0x93   :  { %v87_v37 = vpack.c.bf16 %v85_v35, %v84_v36 }
  0x95   :  { %180 = vmatpush3.bf16.msra.mxu0 %v87_v37 }
  0x98   :  { %182 = vmatmul.mubr.msk.bf16.vlgmr.msra.gmra.mrb[0].mxu0 %vm95_vm1, %v190_v38 }
 0x16b   :  { %v133_v39 = vpop.f32.mrb[0].mxu0 }
 0x16c   :  { %v183_v40 = vpop.f32.mrb[1].mxu0 }
 0x16d   :  { %v136_v41 = vpop.f32.mrb[2].mxu0 }
 0x16e   :  { %v171_v42 = vpack.c.bf16 %v136_v41, %v133_v39  ;;  %v184_v43 = vpop.f32.mrb[3].mxu0 }
 0x170   :  { %172 = vst [vmem:[%s259_s4] sm:$0xff] %v171_v42  }

// kernel: densenet_upright_forward.17
= control target key start
LH: loop header
LB: loop body
LE: loop exit
PB: predicated region body
PF: predicated region fallthrough
CT: control target
= control target key end

     0   :  { %v244_v0 = vmov 0   ;;  %vm73_vm0 = vcmask 130048   ;;  %vm205_vm1 = vcmask 257024   ;;  %s339_s3 = inlined_call_operand.vmem [shape: f32[16,1], index: 3, kind: input, shape index: {}]   ;;  %s340_s2 = inlined_call_operand.vmem [shape: f32[16,1], index: 2, kind: input, shape index: {}]   ;;  %s341_s4 = inlined_call_operand.vmem [shape: f32[32,1], index: 4, kind: input, shape index: {}]   ;;  %s342_s5 = inlined_call_operand.vmem [shape: f32[32,1], index: 5, kind: input, shape index: {}]   ;;  %s343_s0 = inlined_call_operand.vmem [shape: bf16[32,16], index: 0, kind: input, shape index: {}]   ;;  %s344_s1 = inlined_call_operand.vmem [shape: bf16[16,32], index: 1, kind: input, shape index: {}]   ;;  %s345_s6 = inlined_call_operand.vmem [shape: bf16[32,32], index: 6, kind: output, shape index: {}]  }
   0x1   :  { %241 = vset.pattern.permute.xlu1 %v244_v0  ;;  %240 = vset.pattern.permute.xlu0 %v244_v0  ;;  %v42_v1 = vld [vmem:[%s339_s3] sm:$0xff]  ;;  %v43_v3 = vld [vmem:[%s339_s3 + $0x8] sm:$0xff]  ;;  %v132_v7 = vld [vmem:[%s341_s4 + $0x18] sm:$0xff] }
   0x2   :  { %v28_v2 = vld [vmem:[%s340_s2] sm:$0xff]  ;;  %46 = vperm.xlu1 %241, %v42_v1   ;;  %v29_v4 = vld [vmem:[%s340_s2 + $0x8] sm:$0xff]  ;;  %v131_v8 = vld [vmem:[%s341_s4 + $0x10] sm:$0xff] }
   0x3   :  { %32 = vperm.xlu0 %240, %v28_v2   ;;  %v130_v5 = vld [vmem:[%s341_s4 + $0x8] sm:$0xff]  ;;  %v129_v6 = vld [vmem:[%s341_s4] sm:$0xff]  ;;  %v160_v12 = vld [vmem:[%s342_s5 + $0x18] sm:$0xff] }
   0x4   :  { %v158_v9 = vld [vmem:[%s342_s5 + $0x8] sm:$0xff]  ;;  %v157_v10 = vld [vmem:[%s342_s5] sm:$0xff]  ;;  %v159_v13 = vld [vmem:[%s342_s5 + $0x10] sm:$0xff] }
   0x5   :  { %v242_v11 = vld [vmem:[%s343_s0] sm:$0xff]   ;;  %v243_v28 = vld [vmem:[%s343_s0 + $0x8] sm:$0xff]  }
   0x6   :  { %51 = vperm.xlu1 %241, %v43_v3   ;;  %235 = vmatprep.mubr.msk.bf16.mxu0 %vm73_vm0, %v242_v11  ;;  %v227_v14 = vld [vmem:[%s344_s1] sm:$0xff]  }
   0x7   :  { %37 = vperm.xlu0 %240, %v29_v4   ;;  %v228_v15 = vunpack.c.l.bf16 %v227_v14  ;;  %v229_v19 = vunpack.c.h.bf16 %v227_v14 }
   0xa   :  { %140 = vperm.xlu1 %241, %v130_v5  }
   0xb   :  { %135 = vperm.xlu0 %240, %v129_v6  }
   0xe   :  { %150 = vperm.xlu1 %241, %v132_v7  }
   0xf   :  { %145 = vperm.xlu0 %240, %v131_v8  }
  0x12   :  { %168 = vperm.xlu1 %241, %v158_v9  }
  0x13   :  { %163 = vperm.xlu0 %240, %v157_v10  }
  0x16   :  { %178 = vperm.xlu1 %241, %v160_v12  }
  0x17   :  { %173 = vperm.xlu0 %240, %v159_v13  }
  0x81   :  { %v47_v16 = vpop.permute.xlu1 %46 }
  0x82   :  { %v33_v17 = vpop.permute.xlu0 %32 }
  0x83   :  { %v40_v18 = vmul.f32 %v228_v15, %v33_v17 }
  0x85   :  { %v54_v21 = vadd.f32 %v47_v16, %v40_v18  ;;  %v52_v23 = vpop.permute.xlu1 %51 }
  0x86   :  { %v38_v20 = vpop.permute.xlu0 %37 }
  0x87   :  { %v41_v22 = vmul.f32 %v229_v19, %v38_v20  ;;  %v56_v25 = vmax.f32 %v54_v21, 0.0 }
  0x89   :  { %v55_v24 = vadd.f32 %v52_v23, %v41_v22  ;;  %v141_v30 = vpop.permute.xlu1 %140 }
  0x8a   :  { %v136_v29 = vpop.permute.xlu0 %135 }
  0x8b   :  { %v57_v26 = vmax.f32 %v55_v24, 0.0 }
  0x8d   :  { %v58_v27 = vpack.c.bf16 %v57_v26, %v56_v25  ;;  %v151_v32 = vpop.permute.xlu1 %150 }
  0x8e   :  { %v146_v31 = vpop.permute.xlu0 %145 }
  0x8f   :  { %233 = vmatprep.subr.bf16.mxu0 %v58_v27 }
  0x90   :  { %234 = vmatpush3.bf16.msra.mxu0 %v58_v27 }
  0x91   :  { %v169_v34 = vpop.permute.xlu1 %168 }
  0x92   :  { %v164_v33 = vpop.permute.xlu0 %163 }
  0x93   :  { %236 = vmatmul.mubr.msk.bf16.vlgmr.msra.gmra.mrb[0].mxu0 %vm73_vm0, %v243_v28 }
  0x95   :  { %v179_v44 = vpop.permute.xlu1 %178 }
  0x96   :  { %v174_v38 = vpop.permute.xlu0 %173 }
 0x166   :  { %v237_v35 = vpop.f32.mrb[0].mxu0 }
 0x167   :  { %v155_v36 = vmul.f32 %v237_v35, %v146_v31  ;;  %v114_v37 = vpop.f32.mrb[1].mxu0 }
 0x168   :  { %v153_v39 = vmul.f32 %v136_v29, %v114_v37  ;;  %v238_v40 = vpop.f32.mrb[2].mxu0 }
 0x169   :  { %v183_v41 = vadd.f32 %v174_v38, %v155_v36  ;;  %v156_v42 = vmul.f32 %v238_v40, %v151_v32  ;;  %v117_v43 = vpop.f32.mrb[3].mxu0 }
 0x16a   :  { %v181_v45 = vadd.f32 %v164_v33, %v153_v39  ;;  %v154_v46 = vmul.f32 %v141_v30, %v117_v43 }
 0x16b   :  { %v187_v47 = vmax.f32 %v183_v41, 0.0  ;;  %v184_v48 = vadd.f32 %v179_v44, %v156_v42 }
 0x16c   :  { %v185_v49 = vmax.f32 %v181_v45, 0.0  ;;  %v182_v50 = vadd.f32 %v169_v34, %v154_v46 }
 0x16d   :  { %v224_v51 = vpack.c.bf16 %v187_v47, %v187_v47  ;;  %v188_v52 = vmax.f32 %v184_v48, 0.0 }
 0x16e   :  { %v222_v53 = vpack.c.bf16 %v185_v49, %v185_v49  ;;  %v186_v54 = vmax.f32 %v182_v50, 0.0 }
 0x16f   :  { %208 = vst.msk [vmem:[%s345_s6 + $0x8] sm:$0xf] %vm205_vm1, %v224_v51  ;;  %v225_v55 = vpack.c.bf16 %v188_v52, %v188_v52 }
 0x170   :  { %206 = vst.msk [vmem:[%s345_s6] sm:$0xf] %vm205_vm1, %v222_v53  ;;  %v223_v56 = vpack.c.bf16 %v186_v54, %v186_v54 }
 0x171   :  { %209 = vst.msk [vmem:[%s345_s6 + $0xc] sm:$0xf] %vm205_vm1, %v225_v55 }
 0x172   :  { %207 = vst.msk [vmem:[%s345_s6 + $0x4] sm:$0xf] %vm205_vm1, %v223_v56 }

// kernel: densenet_upright_forward.18
= control target key start
LH: loop header
LB: loop body
LE: loop exit
PB: predicated region body
PF: predicated region fallthrough
CT: control target
= control target key end

     0   :  { %v337_v1 = vmov 0.0   ;;  %vm338_vm0 = vmmov 0   ;;  %vm168_vm1 = vcmask 261120   ;;  %vm253_vm2 = vcmask 257024   ;;  %s417_s1 = inlined_call_operand.vmem [shape: bf16[288,32], index: 1, kind: input, shape index: {}]   ;;  %s418_s0 = inlined_call_operand.vmem [shape: bf16[8,288], index: 0, kind: input, shape index: {}]   ;;  %s419_s2 = inlined_call_operand.vmem [shape: bf16[8,32], index: 2, kind: output, shape index: {}]  }
   0x1   :  { %v316_v0 = vld [vmem:[%s417_s1 + $0x40] sm:$0xff]   ;;  %306 = vmatprep.subr.bf16.mxu1 %v337_v1  ;;  %310 = vmatprep.mubr.msk.bf16.mxu1 %vm338_vm0, %v337_v1  ;;  %v318_v3 = vld [vmem:[%s417_s1 + $0x48] sm:$0xff]   ;;  %v320_v5 = vld [vmem:[%s417_s1 + $0x50] sm:$0xff]  }
   0x2   :  { %v317_v2 = vld [vmem:[%s417_s1] sm:$0xff]   ;;  %281 = vmatprep.subr.bf16.mxu0 %v316_v0  ;;  %v319_v4 = vld [vmem:[%s417_s1 + $0x8] sm:$0xff]   ;;  %v321_v6 = vld [vmem:[%s417_s1 + $0x10] sm:$0xff]  }
   0x3   :  { %282 = vmatpush3.bf16.msra.mxu0 %v317_v2  ;;  %v322_v7 = vld [vmem:[%s417_s1 + $0x58] sm:$0xff]   ;;  %v324_v9 = vld [vmem:[%s417_s1 + $0x60] sm:$0xff]   ;;  %v326_v12 = vld [vmem:[%s417_s1 + $0x68] sm:$0xff]  }
   0x4   :  { %283 = vmatprep.subr.bf16.mxu0 %v318_v3  ;;  %v323_v8 = vld [vmem:[%s417_s1 + $0x18] sm:$0xff]   ;;  %v330_v10 = vld [vmem:[%s417_s1 + $0x80] sm:$0xff]   ;;  %v333_v13 = vld [vmem:[%s417_s1 + $0x88] sm:$0xff]  }
   0x5   :  { %v325_v11 = vld [vmem:[%s417_s1 + $0x20] sm:$0xff]   ;;  %307 = vmatpush3.bf16.msra.mxu1 %v330_v10  ;;  %v327_v15 = vld [vmem:[%s417_s1 + $0x28] sm:$0xff]   ;;  %v328_v18 = vld [vmem:[%s417_s1 + $0x70] sm:$0xff]  }
   0x6   :  { %308 = vmatprep.subr.bf16.mxu1 %v337_v1  ;;  %v48_v14 = vld [vmem:[%s418_s0] sm:$0xff]  ;;  %v336_v17 = vld [vmem:[%s418_s0 + $0x8] ss:$0 sps:$4 sm:$0xff]   ;;  %v329_v19 = vld [vmem:[%s417_s1 + $0x30] sm:$0xff]  }
   0x7   :  { %284 = vmatpush3.bf16.msra.mxu0 %v319_v4  ;;  %v260_v16 = vcombine.high %v48_v14, %v48_v14  ;;  %v331_v20 = vld [vmem:[%s417_s1 + $0x78] sm:$0xff]   ;;  %v259_v22 = vcombine.low %v48_v14, %v48_v14 }
   0x8   :  { %285 = vmatprep.subr.bf16.mxu0 %v320_v5  ;;  %v332_v21 = vld [vmem:[%s417_s1 + $0x38] sm:$0xff]  }
   0x9   :  { %309 = vmatpush3.bf16.msra.mxu1 %v333_v13  ;;  %204 = vmatprep.mubr.bf16.mxu0 %v260_v16 }
   0xb   :  { %286 = vmatpush3.bf16.msra.mxu0 %v321_v6 }
   0xc   :  { %287 = vmatprep.subr.bf16.mxu0 %v322_v7  ;;  %311 = vmatmul.mubr.msk.bf16.vlgmr.msra.gmra.mrb[0].mxu1 %vm168_vm1, %v336_v17 }
   0xf   :  { %288 = vmatpush3.bf16.msra.mxu0 %v323_v8 }
  0x10   :  { %289 = vmatprep.subr.bf16.mxu0 %v324_v9 }
  0x13   :  { %290 = vmatpush3.bf16.msra.mxu0 %v325_v11 }
  0x14   :  { %291 = vmatprep.subr.bf16.mxu0 %v326_v12 }
  0x17   :  { %292 = vmatpush3.bf16.msra.mxu0 %v327_v15 }
  0x18   :  { %293 = vmatprep.subr.bf16.mxu0 %v328_v18 }
  0x1b   :  { %294 = vmatpush3.bf16.msra.mxu0 %v329_v19 }
  0x1c   :  { %295 = vmatprep.subr.bf16.mxu0 %v331_v20 }
  0x1f   :  { %296 = vmatpush3.bf16.msra.mxu0 %v332_v21 }
  0x22   :  { %205 = vmatmul.mubr.bf16.vlgmr.msra.gmra.mrb[0].mxu0 %v259_v22 }
  0xdf   :  { %v246_v23 = vpop.f32.mrb[0].mxu1 }
  0xe0   :  { %v312_v24 = vpop.f32.mrb[1].mxu1 }
  0xe1   :  { %v249_v25 = vpop.f32.mrb[2].mxu1 }
  0xe2   :  { %v313_v26 = vpop.f32.mrb[3].mxu1 }
  0xf5   :  { %v297_v27 = vpop.f32.mrb[0].mxu0 }
  0xf6   :  { %v298_v28 = vpop.f32.mrb[1].mxu0 }
  0xf7   :  { %v299_v29 = vadd.f32 %v298_v28, %v297_v27  ;;  %v300_v30 = vpop.f32.mrb[2].mxu0 }
  0xf8   :  { %v301_v31 = vpop.f32.mrb[3].mxu0 }
  0xf9   :  { %v247_v32 = vadd.f32 %v299_v29, %v246_v23 }
  0xfb   :  { %v252_v33 = vpack.c.bf16 %v247_v32, %v247_v32 }
  0xfd   :  { %254 = vst.msk [vmem:[%s419_s2] sm:$0xf] %vm253_vm2, %v252_v33 }

// kernel: densenet_upright_forward.19
= control target key start
LH: loop header
LB: loop body
LE: loop exit
PB: predicated region body
PF: predicated region fallthrough
CT: control target
= control target key end

     0   :  { %v270_v0 = vmov 0   ;;  %vm91_vm0 = vcmask 195584   ;;  %vm98_vm1 = vcmask 1043456   ;;  %vm227_vm2 = vcmask 257024   ;;  %s374_s3 = inlined_call_operand.vmem [shape: f32[24,1], index: 3, kind: input, shape index: {}]   ;;  %s375_s2 = inlined_call_operand.vmem [shape: f32[24,1], index: 2, kind: input, shape index: {}]   ;;  %s376_s4 = inlined_call_operand.vmem [shape: f32[32,1], index: 4, kind: input, shape index: {}]   ;;  %s377_s5 = inlined_call_operand.vmem [shape: f32[32,1], index: 5, kind: input, shape index: {}]   ;;  %s378_s0 = inlined_call_operand.vmem [shape: bf16[32,24], index: 0, kind: input, shape index: {}]   ;;  %s379_s1 = inlined_call_operand.vmem [shape: bf16[24,32], index: 1, kind: input, shape index: {}]   ;;  %s380_s6 = inlined_call_operand.vmem [shape: bf16[32,32], index: 6, kind: output, shape index: {}]  }
   0x1   :  { %267 = vset.pattern.permute.xlu1 %v270_v0  ;;  %266 = vset.pattern.permute.xlu0 %v270_v0  ;;  %v51_v1 = vld [vmem:[%s374_s3] sm:$0xff]  ;;  %v52_v3 = vld [vmem:[%s374_s3 + $0x8] sm:$0xff]  ;;  %v53_v5 = vld [vmem:[%s374_s3 + $0x10] sm:$0xff] }
   0x2   :  { %v30_v2 = vld [vmem:[%s375_s2] sm:$0xff]  ;;  %56 = vperm.xlu1 %267, %v51_v1   ;;  %v31_v4 = vld [vmem:[%s375_s2 + $0x8] sm:$0xff]  ;;  %v32_v6 = vld [vmem:[%s375_s2 + $0x10] sm:$0xff] }
   0x3   :  { %35 = vperm.xlu0 %266, %v30_v2   ;;  %v152_v7 = vld [vmem:[%s376_s4 + $0x8] sm:$0xff]  ;;  %v151_v8 = vld [vmem:[%s376_s4] sm:$0xff]  ;;  %v154_v9 = vld [vmem:[%s376_s4 + $0x18] sm:$0xff] }
   0x4   :  { %v153_v10 = vld [vmem:[%s376_s4 + $0x10] sm:$0xff]  ;;  %v180_v11 = vld [vmem:[%s377_s5 + $0x8] sm:$0xff]  ;;  %v179_v12 = vld [vmem:[%s377_s5] sm:$0xff] }
   0x5   :  { %v268_v13 = vld [vmem:[%s378_s0] sm:$0xff]   ;;  %v182_v14 = vld [vmem:[%s377_s5 + $0x18] sm:$0xff]  ;;  %v181_v15 = vld [vmem:[%s377_s5 + $0x10] sm:$0xff] }
   0x6   :  { %61 = vperm.xlu1 %267, %v52_v3   ;;  %260 = vmatprep.mubr.msk.bf16.mxu0 %vm91_vm0, %v268_v13  ;;  %v249_v16 = vld [vmem:[%s379_s1] sm:$0xff]   ;;  %v26_v22 = vld [vmem:[%s379_s1 + $0x8] sm:$0xf] }
   0x7   :  { %40 = vperm.xlu0 %266, %v31_v4   ;;  %v250_v17 = vunpack.c.l.bf16 %v249_v16  ;;  %v251_v21 = vunpack.c.h.bf16 %v249_v16  ;;  %v29_v27 = vunpack.c.l.bf16 %v26_v22  ;;  %v269_v39 = vld [vmem:[%s378_s0 + $0x8] sm:$0xff]  }
   0xa   :  { %66 = vperm.xlu1 %267, %v53_v5  }
   0xb   :  { %45 = vperm.xlu0 %266, %v32_v6  }
   0xe   :  { %162 = vperm.xlu1 %267, %v152_v7  }
   0xf   :  { %157 = vperm.xlu0 %266, %v151_v8  }
  0x12   :  { %172 = vperm.xlu1 %267, %v154_v9  }
  0x13   :  { %167 = vperm.xlu0 %266, %v153_v10  }
  0x16   :  { %190 = vperm.xlu1 %267, %v180_v11  }
  0x17   :  { %185 = vperm.xlu0 %266, %v179_v12  }
  0x1a   :  { %200 = vperm.xlu1 %267, %v182_v14  }
  0x1b   :  { %195 = vperm.xlu0 %266, %v181_v15  }
  0x81   :  { %v57_v18 = vpop.permute.xlu1 %56 }
  0x82   :  { %v36_v19 = vpop.permute.xlu0 %35 }
  0x83   :  { %v48_v20 = vmul.f32 %v250_v17, %v36_v19 }
  0x85   :  { %v62_v23 = vpop.permute.xlu1 %61  ;;  %v69_v25 = vadd.f32 %v57_v18, %v48_v20 }
  0x86   :  { %v41_v24 = vpop.permute.xlu0 %40 }
  0x87   :  { %v49_v26 = vmul.f32 %v251_v21, %v41_v24  ;;  %v72_v30 = vmax.f32 %v69_v25, 0.0 }
  0x89   :  { %v70_v28 = vadd.f32 %v62_v23, %v49_v26  ;;  %v67_v33 = vpop.permute.xlu1 %66 }
  0x8a   :  { %v46_v29 = vpop.permute.xlu0 %45 }
  0x8b   :  { %v73_v31 = vmax.f32 %v70_v28, 0.0  ;;  %v50_v32 = vmul.f32 %v46_v29, %v29_v27 }
  0x8d   :  { %v71_v34 = vadd.f32 %v67_v33, %v50_v32  ;;  %v75_v35 = vpack.c.bf16 %v73_v31, %v72_v30  ;;  %v163_v41 = vpop.permute.xlu1 %162 }
  0x8e   :  { %v158_v40 = vpop.permute.xlu0 %157 }
  0x8f   :  { %v74_v36 = vmax.f32 %v71_v34, 0.0  ;;  %256 = vmatprep.subr.bf16.mxu0 %v75_v35 }
  0x90   :  { %257 = vmatpush3.bf16.msra.mxu0 %v75_v35 }
  0x91   :  { %v76_v37 = vpack.c.bf16 %v74_v36, %v74_v36  ;;  %v173_v43 = vpop.permute.xlu1 %172 }
  0x92   :  { %v168_v42 = vpop.permute.xlu0 %167 }
  0x93   :  { %264 = vmatprep.subr.msk.bf16.mxu0 %vm98_vm1, %v76_v37  ;;  %v100_v38 = vsel %vm98_vm1, %v76_v37, 0 }
  0x94   :  { %259 = vmatpush3.bf16.msra.mxu0 %v100_v38 }
  0x95   :  { %v191_v45 = vpop.permute.xlu1 %190 }
  0x96   :  { %v186_v44 = vpop.permute.xlu0 %185 }
  0x97   :  { %261 = vmatmul.mubr.msk.bf16.vlgmr.msra.gmra.mrb[0].mxu0 %vm91_vm0, %v269_v39 }
  0x99   :  { %v201_v55 = vpop.permute.xlu1 %200 }
  0x9a   :  { %v196_v49 = vpop.permute.xlu0 %195 }
 0x16a   :  { %v262_v46 = vpop.f32.mrb[0].mxu0 }
 0x16b   :  { %v177_v47 = vmul.f32 %v262_v46, %v168_v42  ;;  %v136_v48 = vpop.f32.mrb[1].mxu0 }
 0x16c   :  { %v175_v50 = vmul.f32 %v158_v40, %v136_v48  ;;  %v263_v51 = vpop.f32.mrb[2].mxu0 }
 0x16d   :  { %v205_v52 = vadd.f32 %v196_v49, %v177_v47  ;;  %v178_v53 = vmul.f32 %v263_v51, %v173_v43  ;;  %v139_v54 = vpop.f32.mrb[3].mxu0 }
 0x16e   :  { %v203_v56 = vadd.f32 %v186_v44, %v175_v50  ;;  %v176_v57 = vmul.f32 %v163_v41, %v139_v54 }
 0x16f   :  { %v209_v58 = vmax.f32 %v205_v52, 0.0  ;;  %v206_v59 = vadd.f32 %v201_v55, %v178_v53 }
 0x170   :  { %v207_v60 = vmax.f32 %v203_v56, 0.0  ;;  %v204_v61 = vadd.f32 %v191_v45, %v176_v57 }
 0x171   :  { %v246_v62 = vpack.c.bf16 %v209_v58, %v209_v58  ;;  %v210_v63 = vmax.f32 %v206_v59, 0.0 }
 0x172   :  { %v244_v0 = vpack.c.bf16 %v207_v60, %v207_v60  ;;  %v208_v1 = vmax.f32 %v204_v61, 0.0 }
 0x173   :  { %230 = vst.msk [vmem:[%s380_s6 + $0x8] sm:$0xf] %vm227_vm2, %v246_v62  ;;  %v247_v2 = vpack.c.bf16 %v210_v63, %v210_v63 }
 0x174   :  { %228 = vst.msk [vmem:[%s380_s6] sm:$0xf] %vm227_vm2, %v244_v0  ;;  %v245_v3 = vpack.c.bf16 %v208_v1, %v208_v1 }
 0x175   :  { %231 = vst.msk [vmem:[%s380_s6 + $0xc] sm:$0xf] %vm227_vm2, %v247_v2 }
 0x176   :  { %229 = vst.msk [vmem:[%s380_s6 + $0x4] sm:$0xf] %vm227_vm2, %v245_v3 }

// kernel: densenet_upright_forward.21
= control target key start
LH: loop header
LB: loop body
LE: loop exit
PB: predicated region body
PF: predicated region fallthrough
CT: control target
= control target key end

     0   :  { %v100_v30 = vlaneseq  ;;  %v550_v34 = vmov 1966171168   ;;  %s686_s0 = inlined_call_operand.vmem [shape: bf16[2,512], index: 0, kind: input, shape index: {}]   ;;  %s687_s1 = inlined_call_operand.vmem [shape: bf16[512,3], index: 1, kind: input, shape index: {}]   ;;  %s688_s2 = inlined_call_operand.vmem [shape: f32[1,3], index: 2, kind: input, shape index: {}]   ;;  %s689_s3 = inlined_call_operand.hbm [shape: f32[2,3], index: 3, kind: output, shape index: {}]  }
   0x1   :  { %v492_v0 = vld [vmem:[%s687_s1 + $0x40] sm:$0xff]   ;;  %v496_v4 = vld [vmem:[%s687_s1 + $0x48] sm:$0xff]   ;;  %v500_v8 = vld [vmem:[%s687_s1 + $0x50] sm:$0xff]   ;;  %v98_v35 = vunpack.c.l.s4 %v550_v34 }
   0x2   :  { %v493_v1 = vld [vmem:[%s687_s1 + $0xc0] sm:$0xff]   ;;  %446 = vmatprep.subr.bf16.mxu0 %v492_v0  ;;  %v497_v5 = vld [vmem:[%s687_s1 + $0xc8] sm:$0xff]   ;;  %v501_v9 = vld [vmem:[%s687_s1 + $0xd0] sm:$0xff]   ;;  %v101_v36 = vshrl.u32 %v100_v30, 7 }
   0x3   :  { %v494_v2 = vld [vmem:[%s687_s1] sm:$0xff]   ;;  %468 = vmatprep.subr.bf16.mxu1 %v493_v1  ;;  %v498_v6 = vld [vmem:[%s687_s1 + $0x8] sm:$0xff]   ;;  %v502_v10 = vld [vmem:[%s687_s1 + $0x10] sm:$0xff]  }
   0x4   :  { %v495_v3 = vld [vmem:[%s687_s1 + $0x80] sm:$0xff]   ;;  %447 = vmatpush3.bf16.msra.mxu0 %v494_v2  ;;  %v499_v7 = vld [vmem:[%s687_s1 + $0x88] sm:$0xff]   ;;  %v503_v11 = vld [vmem:[%s687_s1 + $0x90] sm:$0xff]  }
   0x5   :  { %469 = vmatpush3.bf16.msra.mxu1 %v495_v3  ;;  %448 = vmatprep.subr.bf16.mxu0 %v496_v4  ;;  %v504_v12 = vld [vmem:[%s687_s1 + $0x58] sm:$0xff]   ;;  %v508_v16 = vld [vmem:[%s687_s1 + $0x60] sm:$0xff]   ;;  %v512_v20 = vld [vmem:[%s687_s1 + $0x68] sm:$0xff]  }
   0x6   :  { %470 = vmatprep.subr.bf16.mxu1 %v497_v5  ;;  %v505_v13 = vld [vmem:[%s687_s1 + $0xd8] sm:$0xff]   ;;  %v509_v17 = vld [vmem:[%s687_s1 + $0xe0] sm:$0xff]   ;;  %v513_v21 = vld [vmem:[%s687_s1 + $0xe8] sm:$0xff]  }
   0x7   :  { %v506_v14 = vld [vmem:[%s687_s1 + $0x18] sm:$0xff]   ;;  %v510_v18 = vld [vmem:[%s687_s1 + $0x20] sm:$0xff]   ;;  %v514_v22 = vld [vmem:[%s687_s1 + $0x28] sm:$0xff]  }
   0x8   :  { %449 = vmatpush3.bf16.msra.mxu0 %v498_v6  ;;  %v507_v15 = vld [vmem:[%s687_s1 + $0x98] sm:$0xff]   ;;  %v511_v19 = vld [vmem:[%s687_s1 + $0xa0] sm:$0xff]   ;;  %v515_v23 = vld [vmem:[%s687_s1 + $0xa8] sm:$0xff]  }
   0x9   :  { %471 = vmatpush3.bf16.msra.mxu1 %v499_v7  ;;  %450 = vmatprep.subr.bf16.mxu0 %v500_v8  ;;  %v516_v24 = vld [vmem:[%s687_s1 + $0x70] sm:$0xff]   ;;  %v520_v28 = vld [vmem:[%s687_s1 + $0x78] sm:$0xff]   ;;  %v413_v33 = vld.sshfl [vmem:[%s686_s0] sm:$0x33 pattern:$0x75316420] }
   0xa   :  { %472 = vmatprep.subr.bf16.mxu1 %v501_v9  ;;  %v517_v25 = vld [vmem:[%s687_s1 + $0xf0] sm:$0xff]   ;;  %v521_v29 = vld [vmem:[%s687_s1 + $0xf8] sm:$0xff]  }
   0xb   :  { %v518_v26 = vld [vmem:[%s687_s1 + $0x30] sm:$0xff]   ;;  %v522_v31 = vld [vmem:[%s687_s1 + $0x38] sm:$0xff]  }
   0xc   :  { %451 = vmatpush3.bf16.msra.mxu0 %v502_v10  ;;  %v519_v27 = vld [vmem:[%s687_s1 + $0xb0] sm:$0xff]   ;;  %v523_v32 = vld [vmem:[%s687_s1 + $0xb8] sm:$0xff]  }
   0xd   :  { %473 = vmatpush3.bf16.msra.mxu1 %v503_v11  ;;  %452 = vmatprep.subr.bf16.mxu0 %v504_v12 }
   0xe   :  { %474 = vmatprep.subr.bf16.mxu1 %v505_v13 }
  0x10   :  { %453 = vmatpush3.bf16.msra.mxu0 %v506_v14 }
  0x11   :  { %475 = vmatpush3.bf16.msra.mxu1 %v507_v15  ;;  %454 = vmatprep.subr.bf16.mxu0 %v508_v16 }
  0x12   :  { %476 = vmatprep.subr.bf16.mxu1 %v509_v17 }
  0x14   :  { %455 = vmatpush3.bf16.msra.mxu0 %v510_v18 }
  0x15   :  { %477 = vmatpush3.bf16.msra.mxu1 %v511_v19  ;;  %456 = vmatprep.subr.bf16.mxu0 %v512_v20 }
  0x16   :  { %478 = vmatprep.subr.bf16.mxu1 %v513_v21 }
  0x18   :  { %457 = vmatpush3.bf16.msra.mxu0 %v514_v22 }
  0x19   :  { %479 = vmatpush3.bf16.msra.mxu1 %v515_v23  ;;  %458 = vmatprep.subr.bf16.mxu0 %v516_v24 }
  0x1a   :  { %480 = vmatprep.subr.bf16.mxu1 %v517_v25 }
  0x1c   :  { %459 = vmatpush3.bf16.msra.mxu0 %v518_v26 }
  0x1d   :  { %481 = vmatpush3.bf16.msra.mxu1 %v519_v27  ;;  %460 = vmatprep.subr.bf16.mxu0 %v520_v28 }
  0x1e   :  { %482 = vmatprep.subr.bf16.mxu1 %v521_v29 }
  0x20   :  { %461 = vmatpush3.bf16.msra.mxu0 %v522_v31 }
  0x21   :  { %483 = vmatpush3.bf16.msra.mxu1 %v523_v32 }
  0x22   :  { %8 = vsyncpa [#allocation3], 0  ;;  %v96_v37 = vcombine.high %v413_v33, %v413_v33  ;;  %v99_v38 = vunpack.c.0.s8 %v98_v35  ;;  %v412_v45 = vld [vmem:[%s688_s2] ss:$0 sm:$0xff]  ;;  %vm390_vm0 = vcmask 17408   ;;  %s551_s0 = smov [#allocation2]  }
  0x23   :  { %s404_s2 = sshll.u32 %s551_s0, 4  ;;  %s405_s2 = int_to_ptr.vmem [resolvable:$true] %s404_s2 }
  0x24   :  { %v102_v39 = vsub.s32 %v99_v38, %v101_v36  ;;  %s526_s25 = scalar_lea.vmem %s405_s2, 32  ;;  %p531_p1 = scmp.lt.s32.totalorder %s405_s2, %s405_s2 }
  0x25   :  { %p527_p0 = scmp.ne.s32.totalorder %s405_s2, %s526_s25  ;;  %p532_p2 = scmp.lt.s32.totalorder %s526_s25, %s526_s25 }
  0x26   :  { %v110_v40 = vrot.slane %v96_v37, %v102_v39  ;;  %v103_v41 = vrot.slane %v413_v33, %v102_v39 }
  0x27   :  { %p533_p3 = por %p532_p2, %p531_p1 }
  0x28   :  { %341 = vmatprep.mubr.bf16.mxu0 %v110_v40  ;;  %v112_v42 = vcombine.high %v110_v40, %v110_v40  ;;  %v111_v43 = vcombine.high %v103_v41, %v103_v41 }
  0x29   :  { %342 = vmatmul.mubr.bf16.vlgmr.msra.gmra.mrb[0].mxu0 %v103_v41  ;;  %p534_p4 = pnand %p533_p3, %p527_p0 }
  0x2a   :  { %381 = vmatprep.mubr.bf16.mxu1 %v112_v42 }
  0x2b   :  { %382 = vmatmul.mubr.bf16.vlgmr.msra.gmra.mrb[0].mxu1 %v111_v43 }
  0xfc   :  { %v462_v44 = vpop.f32.mrb[0].mxu0 }
  0xfd   :  { %v463_v46 = vpop.f32.mrb[1].mxu0 }
  0xfe   :  { %v484_v47 = vpop.f32.mrb[0].mxu1  ;;  %v464_v48 = vadd.f32 %v463_v46, %v462_v44  ;;  %v465_v49 = vpop.f32.mrb[2].mxu0 }
  0xff   :  { %v485_v50 = vpop.f32.mrb[1].mxu1  ;;  %v466_v51 = vpop.f32.mrb[3].mxu0 }
 0x100   :  { %v344_v52 = vadd.f32 %v464_v48, %v412_v45  ;;  %v486_v53 = vadd.f32 %v485_v50, %v484_v47  ;;  %v487_v54 = vpop.f32.mrb[2].mxu1 }
 0x101   :  { %v488_v55 = vpop.f32.mrb[3].mxu1 }
 0x102   :  { %v384_v56 = vadd.f32 %v486_v53, %v344_v52 }
 0x104   :  { %v389_v57 = vmul.f32 %v384_v56, %v384_v56 }
 0x106   :  { %v391_v58 = vsel %vm390_vm0, %v389_v57, 0.0 }
 0x107   :  { %392 = vadd.xlane.f32.xlu0 %v391_v58 }
 0x194   :  { %v393_v59 = vpop.xlane.xlu0 %392 }
 0x195   :  { %v394_v60 = vmax.f32 %v393_v59, 1e-24 }
 0x197   :  { %524 = vrsqrt.f32 %v394_v60 }
 0x1a1   :  { %v525_v61 = vpop.eup %524 }
 0x1a2   :  { %v396_v62 = vmul.f32 %v525_v61, %v384_v56 }
 0x1a4   :  { %397 = vst.msk [vmem:[#allocation2] sm:$0x3] %vm390_vm0, %v396_v62 }
 0x1a5   :  { %537 = shalt.err (!%p534_p4)
}
 0x1a6   :  { %s538_s28 = scalar_lea.hbm %s689_s3, 32 }
 0x1a7   :  { %p539_p5 = scmp.ne.s32.totalorder %s689_s3, %s538_s28  ;;  %p542_p6 = scmp.lt.u32.totalorder %s538_s28, %s689_s3 }
 0x1a9   :  { %p544_p7 = pnand %p542_p6, %p539_p5 }
 0x1ab   :  { %547 = shalt.err (!%p544_p7)
}
 0x1ac   :  { %407 = dma.vmem_to_hbm [thread:$0]  %s405_s2, 32, %s689_s3, [#allocation3]  }
 0x1ad   :  { %548 = dma.done.wait [#allocation3], 32  }
 0x1ae   :  { %549 = vsyncadd [#allocation3], 4294967264 }
 0x1af   :  { %411 = vsyncpa [#allocation3], 1 }

</bundles_post_ra>
